<compile_context>
chip_gen: v6e
topology: v6e:2x2x1
jax: 0.10.0
libtpu: 0.0.40
codegen_flags: <defaults>
</compile_context>

<pallas_src>
import functools

import jax
import jax.numpy as jnp
from jax.experimental import pallas as pl
from jax.experimental.pallas import tpu as pltpu

GEM_P = 3.0
GEM_EPS = 1e-6
BN_EPS = 1e-5


def _head_kernel(c3_ref, c4_ref, w5_ref, bn_ref, out_ref,
                 c4p_ref, x41_ref, pooled_ref, *, hw, c4_ch, c3_ch, bb):
    """One grid step = `bb` images, NCHW-native (channels on sublanes, H*W on lanes).

    c3_ref : (bb, C3, HW)        layer3 feature map (native dtype)
    c4_ref : (bb, C4, HW)        layer4 feature map (native dtype)
    w5_ref : (C3, C4) bf16       conv5 1x1 weight (out_ch, in_ch), resident
    bn_ref : (2, C4+C3) f32      folded BN, row 0 = scale, row 1 = bias (lane-dense)
    out_ref: (bb, C4+C3) f32     cat(bottleneck(GeM(c4)), bottleneck_sub3(GeM(x)))
    c4p_ref   : (C4, bb*HW) bf16 scratch -- lane-packed c4 for the batched matmul
    x41_ref   : (C3, bb*HW) f32  scratch -- conv5 output
    pooled_ref: (C4+C3, 128) f32 scratch -- per-image GeM means^p (column b = image b)
    """
    inv_hw = 1.0 / float(hw)

    # ---- 1) lane-pack the bb c4 images -> (C4, bb*HW) bf16 (128-aligned static copies)
    for b in range(bb):
        c4p_ref[:, b * hw:(b + 1) * hw] = c4_ref[b].astype(jnp.bfloat16)

    # ---- 2) conv5 as ONE batched channel matmul: (C3,C4)@(C4,bb*HW), f32 accumulation
    x41_ref[...] = jnp.dot(w5_ref[...], c4p_ref[...],
                           preferred_element_type=jnp.float32)

    # ---- 3) per-image FPN add + GeM (p=3: clamp -> v*v*v on VPU -> lane-mean on XLU)
    def per_image(b, off):
        x41_b = x41_ref[:, pl.ds(off, hw)]                              # (C3, HW) f32
        x_b = c3_ref[b].astype(jnp.float32) + jnp.maximum(x41_b, 0.0)   # FPN residual
        c4_b = c4_ref[b].astype(jnp.float32)                            # (C4, HW)

        def gem_mean_pow_p(v):
            v = jnp.maximum(v, GEM_EPS)
            return jnp.sum(v * v * v, axis=-1, keepdims=True) * inv_hw  # (C, 1) f32

        # Column writes are thin (1-lane) stores to a single-buffered VMEM scratch;
        # the pooled data is tiny so this stays off the critical (MXU) path.
        pooled_ref[0:c4_ch, pl.ds(b, 1)] = gem_mean_pow_p(c4_b)
        pooled_ref[c4_ch:c4_ch + c3_ch, pl.ds(b, 1)] = gem_mean_pow_p(x_b)

    if bb <= 4:
        # Short fixed trip count: static unroll (LLO visibility), per review.
        for b in range(bb):
            per_image(b, b * hw)
    else:
        # Larger bb: scf.for bounds the live range of the f32 (C,HW) intermediates.
        @pl.loop(0, bb)
        def _(b):
            off = b * hw
            if hw % 128 == 0:
                off = pl.multiple_of(off, 128)
            per_image(b, off)

    # ---- 4) relayout pooled columns -> rows (small XLU transpose, well-tiled shape),
    #         cube root only on the tiny (bb, C4+C3) slab, folded-BN FMA, lane-dense store.
    rows = jnp.transpose(pooled_ref[...])                    # (128, C4+C3)
    g = jnp.maximum(rows[0:bb, :], 0.0) ** (1.0 / GEM_P)     # (bb, C4+C3)
    out_ref[...] = (g * bn_ref[0:1, :] + bn_ref[1:2, :]).astype(out_ref.dtype)


def _fold_bn(p):
    """p rows: [gamma, beta, running_mean, running_var] -> (scale, bias) for eval BN."""
    gamma, beta, mean, var = p[0], p[1], p[2], p[3]
    scale = gamma * jax.lax.rsqrt(var + BN_EPS)
    return scale, beta - mean * scale


def _pick_vmem_limit_bytes():
    """~52 MiB on v7x (64 MiB physical), ~96 MiB on v5e/v6e (128 MiB physical)."""
    cap = 64 * 1024 * 1024
    try:
        info = pltpu.get_tpu_info()
        cap = int(getattr(info, "vmem_capacity_bytes", cap))
    except Exception:
        pass
    return int(min(max(cap - 12 * 1024 * 1024, 32 * 1024 * 1024), 96 * 1024 * 1024))


def backbone_fpn_head(c3_nchw, c4_nchw, w5, bn4_params, bn3_params, *, batch_block=4):
    """Eval forward of the Backbone_fpn head. Returns cat(feat, sub_bn3): (B, C4+C3).

    c3_nchw : (B, C3, H, W)  base.layer3 output (post BatchDrop; identity in eval)
    c4_nchw : (B, C4, H, W)  base.layer4 output (post BatchDrop; identity in eval)
    w5      : (C3, C4)       conv5 weight, i.e. torch weight (C3, C4, 1, 1) squeezed
    bn*_params: (4, C) rows = [gamma, beta, running_mean, running_var]
    batch_block: images per grid step (4 default; ~8 pays off on v5e / bf16 features)
    """
    B, C3, H, W = c3_nchw.shape
    _, C4, _, _ = c4_nchw.shape
    HW = H * W
    C_all = C4 + C3

    # NCHW -> (B, C, H*W) is a pure reshape.  Feature maps are passed in their NATIVE
    # dtype (no wrapper bf16 cast -> no extra HBM round trip of the full maps); the
    # kernel casts to bf16 only for the MXU operand.
    c3 = c3_nchw.reshape(B, C3, HW)
    c4 = c4_nchw.reshape(B, C4, HW)
    w5b = w5.astype(jnp.bfloat16)  # tiny relative to the feature maps

    # Fold eval BatchNorm1d into scale/bias, lane-dense (2, C4+C3) layout
    # (channel order matches torch.cat((feat, sub_bn3), 1)).
    s4, b4 = _fold_bn(bn4_params.astype(jnp.float32))
    s3, b3 = _fold_bn(bn3_params.astype(jnp.float32))
    bn_sb = jnp.stack([jnp.concatenate([s4, s3]),
                       jnp.concatenate([b4, b3])], axis=0)       # (2, C4+C3) f32

    # Images per grid step: feeds the MXU N = bb*HW and amortizes per-step overhead,
    # but keep >= 2 grid steps so both v7x TensorCores get work.
    bb = max(1, min(int(batch_block), pl.cdiv(B, 2)))
    bb = min(bb, 128)
    G = pl.cdiv(B, bb)
    B_pad = G * bb
    if B_pad != B:
        # Explicit zero padding instead of a silent bb=1 fallback (padded images are
        # computed independently and sliced off below).
        c3 = jnp.pad(c3, ((0, B_pad - B), (0, 0), (0, 0)))
        c4 = jnp.pad(c4, ((0, B_pad - B), (0, 0), (0, 0)))

    kernel = functools.partial(_head_kernel, hw=HW, c4_ch=C4, c3_ch=C3, bb=bb)
    out = pl.pallas_call(
        kernel,
        out_shape=jax.ShapeDtypeStruct((G, bb, C_all), jnp.float32),
        grid=(G,),
        in_specs=[
            pl.BlockSpec((bb, C3, HW), lambda i: (i, 0, 0)),
            pl.BlockSpec((bb, C4, HW), lambda i: (i, 0, 0)),
            pl.BlockSpec((C3, C4), lambda i: (0, 0)),        # resident conv5 weight
            pl.BlockSpec((2, C_all), lambda i: (0, 0)),      # resident folded BN (lane-dense)
        ],
        out_specs=pl.BlockSpec((None, bb, C_all), lambda i: (i, 0, 0)),
        scratch_shapes=[
            pltpu.VMEM((C4, bb * HW), jnp.bfloat16),         # lane-packed c4
            pltpu.VMEM((C3, bb * HW), jnp.float32),          # conv5 output
            pltpu.VMEM((C_all, 128), jnp.float32),           # pooled GeM means^p
        ],
        compiler_params=pltpu.CompilerParams(
            dimension_semantics=("parallel",),               # batch axis -> v7x megacore
            vmem_limit_bytes=_pick_vmem_limit_bytes(),
        ),
    )(c3, c4, w5b, bn_sb)

    # (G, bb, C4+C3) -> (B, C4+C3): pure reshape + slice of the tiny pooled result.
    return out.reshape(B_pad, C_all)[:B]


def _reference(c3_nchw, c4_nchw, w5, bn4_params, bn3_params):
    """Pure-JAX f32 reference of the same eval forward (inputs may be bf16)."""
    B, C3, H, W = c3_nchw.shape
    _, C4, _, _ = c4_nchw.shape
    c3 = c3_nchw.astype(jnp.float32).reshape(B, C3, H * W)
    c4 = c4_nchw.astype(jnp.float32).reshape(B, C4, H * W)
    x41 = jnp.maximum(jnp.einsum("oc,bch->boh", w5.astype(jnp.float32), c4), 0.0)
    x = c3 + x41

    def gem(v):
        return jnp.mean(jnp.maximum(v, GEM_EPS) ** GEM_P, axis=-1) ** (1.0 / GEM_P)

    def bn(g, p):
        return (g - p[2]) * jax.lax.rsqrt(p[3] + BN_EPS) * p[0] + p[1]

    return jnp.concatenate([bn(gem(c4), bn4_params), bn(gem(x), bn3_params)], axis=1)


if __name__ == "__main__":
    # Small, lane-aligned shapes keeping the module's 2:1 channel ratio
    # (module: C3=1024, C4=2048; here scaled down).  H*W = 128 -> lane-dense.
    # B=5 with batch_block=2 exercises the lane-packed batched matmul (bb=2),
    # the per-image loop, and the explicit remainder padding path.
    B, C3, C4, H, W = 5, 128, 256, 16, 8
    key = jax.random.PRNGKey(0)
    k1, k2, k3, k4, k5 = jax.random.split(key, 5)

    # Backbone feature maps (bf16, as a bf16 backbone would emit), NCHW.
    c3_feat = jax.random.normal(k1, (B, C3, H, W), jnp.float32).astype(jnp.bfloat16)
    c4_feat = jax.random.normal(k2, (B, C4, H, W), jnp.float32).astype(jnp.bfloat16)

    # conv5: nn.Conv2d(C4, C3, kernel_size=1, bias=False); torch weight (C3, C4, 1, 1)
    # squeezed to (C3, C4) -- no transpose needed for the channel matmul.
    w5 = (jax.random.normal(k3, (C3, C4), jnp.float32) * 0.05).astype(jnp.bfloat16)

    # BatchNorm1d params (rows: gamma, beta, running_mean, running_var); randomized so
    # the folded-BN path is actually exercised (kaiming init would be the identity BN).
    def rand_bn(k, c):
        kg, kb, km, kv = jax.random.split(k, 4)
        gamma = 1.0 + 0.1 * jax.random.normal(kg, (c,), jnp.float32)
        beta = 0.1 * jax.random.normal(kb, (c,), jnp.float32)
        mean = 0.1 * jax.random.normal(km, (c,), jnp.float32)
        var = jax.random.uniform(kv, (c,), jnp.float32, minval=0.5, maxval=1.5)
        return jnp.stack([gamma, beta, mean, var])

    bn4_params = rand_bn(k4, C4)   # bottleneck      (in_planes channels)
    bn3_params = rand_bn(k5, C3)   # bottleneck_sub3 (in_planes/2 channels)

    out = backbone_fpn_head(c3_feat, c4_feat, w5, bn4_params, bn3_params, batch_block=2)
    out = jax.block_until_ready(out)

    ref = _reference(c3_feat, c4_feat, w5, bn4_params, bn3_params)
    assert out.shape == (B, C4 + C3), out.shape
    max_err = float(jnp.max(jnp.abs(out - ref)))
    assert jnp.allclose(out, ref, rtol=5e-3, atol=5e-3), f"mismatch vs JAX reference, max_err={max_err}"

    print("KERNEL_OK")
</pallas_src>

<mosaic_0001>
module attributes {stable_mosaic.version = 11 : i64} {
  func.func @_head_kernel(%arg0: i32, %arg1: memref<2x128x128xbf16, #tpu.memory_space<vmem>>, %arg2: memref<2x256x128xbf16, #tpu.memory_space<vmem>>, %arg3: memref<128x256xbf16, #tpu.memory_space<vmem>>, %arg4: memref<2x384xf32, #tpu.memory_space<vmem>>, %arg5: memref<1x2x384xf32, #tpu.memory_space<vmem>>, %arg6: memref<256x256xbf16, #tpu.memory_space<vmem>>, %arg7: memref<128x256xf32, #tpu.memory_space<vmem>>, %arg8: memref<384x128xf32, #tpu.memory_space<vmem>>) attributes {dimension_semantics = [#tpu.dimension_semantics<parallel>], iteration_bounds = array<i64: 3>, scalar_prefetch = 0 : i64, scratch_operands = 3 : i64, tpu.core_type = #tpu.core_type<tc>, window_params = [{transform_indices = @transform_0, window_bounds = array<i64: 2, 128, 128>}, {transform_indices = @transform_1, window_bounds = array<i64: 2, 256, 128>}, {pipeline_mode = #tpu.pipeline_mode<synchronous>, transform_indices = @transform_2, window_bounds = array<i64: 128, 256>}, {pipeline_mode = #tpu.pipeline_mode<synchronous>, transform_indices = @transform_3, window_bounds = array<i64: 2, 384>}, {transform_indices = @transform_4, window_bounds = array<i64: 1, 2, 384>}]} {
    %c0 = arith.constant 0 : index
    %c0_0 = arith.constant 0 : index
    %c0_1 = arith.constant 0 : index
    %0 = vector.load %arg2[%c0, %c0_0, %c0_1] : memref<2x256x128xbf16, #tpu.memory_space<vmem>>, vector<1x256x128xbf16>
    %1 = vector.shape_cast %0 : vector<1x256x128xbf16> to vector<256x128xbf16>
    %c0_2 = arith.constant 0 : index
    %c0_3 = arith.constant 0 : index
    %2 = vector.load %arg6[%c0_2, %c0_3] : memref<256x256xbf16, #tpu.memory_space<vmem>>, vector<256x128xbf16>
    tpu.vector_store %arg6[%c0_2, %c0_3], %1 {strides = array<i32>} : memref<256x256xbf16, #tpu.memory_space<vmem>>, vector<256x128xbf16>,
    %c1 = arith.constant 1 : index
    %c0_4 = arith.constant 0 : index
    %c0_5 = arith.constant 0 : index
    %3 = vector.load %arg2[%c1, %c0_4, %c0_5] : memref<2x256x128xbf16, #tpu.memory_space<vmem>>, vector<1x256x128xbf16>
    %4 = vector.shape_cast %3 : vector<1x256x128xbf16> to vector<256x128xbf16>
    %c0_6 = arith.constant 0 : index
    %c128 = arith.constant 128 : index
    %5 = vector.load %arg6[%c0_6, %c128] : memref<256x256xbf16, #tpu.memory_space<vmem>>, vector<256x128xbf16>
    tpu.vector_store %arg6[%c0_6, %c128], %4 {strides = array<i32>} : memref<256x256xbf16, #tpu.memory_space<vmem>>, vector<256x128xbf16>,
    %c0_7 = arith.constant 0 : index
    %c0_8 = arith.constant 0 : index
    %6 = vector.load %arg3[%c0_7, %c0_8] : memref<128x256xbf16, #tpu.memory_space<vmem>>, vector<128x256xbf16>
    %c0_9 = arith.constant 0 : index
    %c0_10 = arith.constant 0 : index
    %7 = vector.load %arg6[%c0_9, %c0_10] : memref<256x256xbf16, #tpu.memory_space<vmem>>, vector<256x256xbf16>
    %cst = arith.constant dense<0.000000e+00> : vector<128x256xf32>
    %8 = tpu.matmul %6, %7, %cst {dimension_numbers = #tpu.dot_dimension_numbers<[1], [0], [0], [1], [0, 0, 1, 1], [], []>} : vector<128x256xbf16>, vector<256x256xbf16>, vector<128x256xf32> -> vector<128x256xf32>
    %c0_11 = arith.constant 0 : index
    %c0_12 = arith.constant 0 : index
    %9 = vector.load %arg7[%c0_11, %c0_12] : memref<128x256xf32, #tpu.memory_space<vmem>>, vector<128x256xf32>
    tpu.vector_store %arg7[%c0_11, %c0_12], %8 {strides = array<i32>} : memref<128x256xf32, #tpu.memory_space<vmem>>, vector<128x256xf32>,
    %c0_13 = arith.constant 0 : index
    %c0_14 = arith.constant 0 : index
    %10 = vector.load %arg7[%c0_13, %c0_14] : memref<128x256xf32, #tpu.memory_space<vmem>>, vector<128x128xf32>
    %c0_15 = arith.constant 0 : index
    %c0_16 = arith.constant 0 : index
    %c0_17 = arith.constant 0 : index
    %11 = vector.load %arg1[%c0_15, %c0_16, %c0_17] : memref<2x128x128xbf16, #tpu.memory_space<vmem>>, vector<1x128x128xbf16>
    %12 = vector.shape_cast %11 : vector<1x128x128xbf16> to vector<128x128xbf16>
    %13 = arith.extf %12 : vector<128x128xbf16> to vector<128x128xf32>
    %cst_18 = arith.constant 0.000000e+00 : f32
    %14 = vector.broadcast %cst_18 : f32 to vector<128x128xf32>
    %15 = arith.maximumf %10, %14 : vector<128x128xf32>
    %16 = arith.addf %13, %15 : vector<128x128xf32>
    %c0_19 = arith.constant 0 : index
    %c0_20 = arith.constant 0 : index
    %c0_21 = arith.constant 0 : index
    %17 = vector.load %arg2[%c0_19, %c0_20, %c0_21] : memref<2x256x128xbf16, #tpu.memory_space<vmem>>, vector<1x256x128xbf16>
    %18 = vector.shape_cast %17 : vector<1x256x128xbf16> to vector<256x128xbf16>
    %19 = arith.extf %18 : vector<256x128xbf16> to vector<256x128xf32>
    %cst_22 = arith.constant 9.99999997E-7 : f32
    %20 = vector.broadcast %cst_22 : f32 to vector<256x128xf32>
    %21 = arith.maximumf %19, %20 : vector<256x128xf32>
    %22 = arith.mulf %21, %21 : vector<256x128xf32>
    %23 = arith.mulf %22, %21 : vector<256x128xf32>
    %cst_23 = arith.constant dense<0.000000e+00> : vector<256xf32>
    %24 = vector.multi_reduction <add>, %23, %cst_23 [1] : vector<256x128xf32> to vector<256xf32>
    %25 = vector.shape_cast %24 : vector<256xf32> to vector<256x1xf32>
    %cst_24 = arith.constant 7.812500e-03 : f32
    %26 = vector.broadcast %cst_24 : f32 to vector<256x1xf32>
    %27 = arith.mulf %25, %26 : vector<256x1xf32>
    %c0_25 = arith.constant 0 : index
    %c0_26 = arith.constant 0 : index
    %28 = vector.load %arg8[%c0_25, %c0_26] : memref<384x128xf32, #tpu.memory_space<vmem>>, vector<256x1xf32>
    tpu.vector_store %arg8[%c0_25, %c0_26], %27 {strides = array<i32>} : memref<384x128xf32, #tpu.memory_space<vmem>>, vector<256x1xf32>,
    %cst_27 = arith.constant 9.99999997E-7 : f32
    %29 = vector.broadcast %cst_27 : f32 to vector<128x128xf32>
    %30 = arith.maximumf %16, %29 : vector<128x128xf32>
    %31 = arith.mulf %30, %30 : vector<128x128xf32>
    %32 = arith.mulf %31, %30 : vector<128x128xf32>
    %cst_28 = arith.constant dense<0.000000e+00> : vector<128xf32>
    %33 = vector.multi_reduction <add>, %32, %cst_28 [1] : vector<128x128xf32> to vector<128xf32>
    %34 = vector.shape_cast %33 : vector<128xf32> to vector<128x1xf32>
    %cst_29 = arith.constant 7.812500e-03 : f32
    %35 = vector.broadcast %cst_29 : f32 to vector<128x1xf32>
    %36 = arith.mulf %34, %35 : vector<128x1xf32>
    %c256 = arith.constant 256 : index
    %c0_30 = arith.constant 0 : index
    %37 = vector.load %arg8[%c256, %c0_30] : memref<384x128xf32, #tpu.memory_space<vmem>>, vector<128x1xf32>
    tpu.vector_store %arg8[%c256, %c0_30], %36 {strides = array<i32>} : memref<384x128xf32, #tpu.memory_space<vmem>>, vector<128x1xf32>,
    %c0_31 = arith.constant 0 : index
    %c128_32 = arith.constant 128 : index
    %38 = vector.load %arg7[%c0_31, %c128_32] : memref<128x256xf32, #tpu.memory_space<vmem>>, vector<128x128xf32>
    %c1_33 = arith.constant 1 : index
    %c0_34 = arith.constant 0 : index
    %c0_35 = arith.constant 0 : index
    %39 = vector.load %arg1[%c1_33, %c0_34, %c0_35] : memref<2x128x128xbf16, #tpu.memory_space<vmem>>, vector<1x128x128xbf16>
    %40 = vector.shape_cast %39 : vector<1x128x128xbf16> to vector<128x128xbf16>
    %41 = arith.extf %40 : vector<128x128xbf16> to vector<128x128xf32>
    %cst_36 = arith.constant 0.000000e+00 : f32
    %42 = vector.broadcast %cst_36 : f32 to vector<128x128xf32>
    %43 = arith.maximumf %38, %42 : vector<128x128xf32>
    %44 = arith.addf %41, %43 : vector<128x128xf32>
    %c1_37 = arith.constant 1 : index
    %c0_38 = arith.constant 0 : index
    %c0_39 = arith.constant 0 : index
    %45 = vector.load %arg2[%c1_37, %c0_38, %c0_39] : memref<2x256x128xbf16, #tpu.memory_space<vmem>>, vector<1x256x128xbf16>
    %46 = vector.shape_cast %45 : vector<1x256x128xbf16> to vector<256x128xbf16>
    %47 = arith.extf %46 : vector<256x128xbf16> to vector<256x128xf32>
    %cst_40 = arith.constant 9.99999997E-7 : f32
    %48 = vector.broadcast %cst_40 : f32 to vector<256x128xf32>
    %49 = arith.maximumf %47, %48 : vector<256x128xf32>
    %50 = arith.mulf %49, %49 : vector<256x128xf32>
    %51 = arith.mulf %50, %49 : vector<256x128xf32>
    %cst_41 = arith.constant dense<0.000000e+00> : vector<256xf32>
    %52 = vector.multi_reduction <add>, %51, %cst_41 [1] : vector<256x128xf32> to vector<256xf32>
    %53 = vector.shape_cast %52 : vector<256xf32> to vector<256x1xf32>
    %cst_42 = arith.constant 7.812500e-03 : f32
    %54 = vector.broadcast %cst_42 : f32 to vector<256x1xf32>
    %55 = arith.mulf %53, %54 : vector<256x1xf32>
    %c0_43 = arith.constant 0 : index
    %c1_44 = arith.constant 1 : index
    %56 = vector.load %arg8[%c0_43, %c1_44] : memref<384x128xf32, #tpu.memory_space<vmem>>, vector<256x1xf32>
    tpu.vector_store %arg8[%c0_43, %c1_44], %55 {strides = array<i32>} : memref<384x128xf32, #tpu.memory_space<vmem>>, vector<256x1xf32>,
    %cst_45 = arith.constant 9.99999997E-7 : f32
    %57 = vector.broadcast %cst_45 : f32 to vector<128x128xf32>
    %58 = arith.maximumf %44, %57 : vector<128x128xf32>
    %59 = arith.mulf %58, %58 : vector<128x128xf32>
    %60 = arith.mulf %59, %58 : vector<128x128xf32>
    %cst_46 = arith.constant dense<0.000000e+00> : vector<128xf32>
    %61 = vector.multi_reduction <add>, %60, %cst_46 [1] : vector<128x128xf32> to vector<128xf32>
    %62 = vector.shape_cast %61 : vector<128xf32> to vector<128x1xf32>
    %cst_47 = arith.constant 7.812500e-03 : f32
    %63 = vector.broadcast %cst_47 : f32 to vector<128x1xf32>
    %64 = arith.mulf %62, %63 : vector<128x1xf32>
    %c256_48 = arith.constant 256 : index
    %c1_49 = arith.constant 1 : index
    %65 = vector.load %arg8[%c256_48, %c1_49] : memref<384x128xf32, #tpu.memory_space<vmem>>, vector<128x1xf32>
    tpu.vector_store %arg8[%c256_48, %c1_49], %64 {strides = array<i32>} : memref<384x128xf32, #tpu.memory_space<vmem>>, vector<128x1xf32>,
    %c0_50 = arith.constant 0 : index
    %c0_51 = arith.constant 0 : index
    %66 = vector.load %arg8[%c0_50, %c0_51] : memref<384x128xf32, #tpu.memory_space<vmem>>, vector<384x128xf32>
    %67 = tpu.transpose %66, [1, 0] : vector<384x128xf32> -> vector<128x384xf32>
    %68 = vector.extract_strided_slice %67 {offsets = [0, 0], sizes = [2, 384], strides = [1, 1]} : vector<128x384xf32> to vector<2x384xf32>
    %cst_52 = arith.constant 0.000000e+00 : f32
    %69 = vector.broadcast %cst_52 : f32 to vector<2x384xf32>
    %70 = arith.maximumf %68, %69 : vector<2x384xf32>
    %cst_53 = arith.constant 0.333333343 : f32
    %71 = vector.broadcast %cst_53 : f32 to vector<2x384xf32>
    %72 = math.powf %70, %71 : vector<2x384xf32>
    %c0_54 = arith.constant 0 : index
    %c0_55 = arith.constant 0 : index
    %73 = vector.load %arg4[%c0_54, %c0_55] : memref<2x384xf32, #tpu.memory_space<vmem>>, vector<1x384xf32>
    %74 = vector.broadcast %73 : vector<1x384xf32> to vector<2x384xf32>
    %75 = arith.mulf %72, %74 : vector<2x384xf32>
    %c1_56 = arith.constant 1 : index
    %c0_57 = arith.constant 0 : index
    %76 = vector.load %arg4[%c1_56, %c0_57] : memref<2x384xf32, #tpu.memory_space<vmem>>, vector<1x384xf32>
    %77 = vector.broadcast %76 : vector<1x384xf32> to vector<2x384xf32>
    %78 = arith.addf %75, %77 : vector<2x384xf32>
    %c0_58 = arith.constant 0 : index
    %c0_59 = arith.constant 0 : index
    %c0_60 = arith.constant 0 : index
    %79 = vector.load %arg5[%c0_58, %c0_59, %c0_60] : memref<1x2x384xf32, #tpu.memory_space<vmem>>, vector<1x2x384xf32>
    %80 = vector.shape_cast %79 : vector<1x2x384xf32> to vector<2x384xf32>
    %81 = vector.shape_cast %78 : vector<2x384xf32> to vector<1x2x384xf32>
    tpu.vector_store %arg5[%c0_58, %c0_59, %c0_60], %81 {strides = array<i32>} : memref<1x2x384xf32, #tpu.memory_space<vmem>>, vector<1x2x384xf32>,
    return
  }
  func.func @transform_0(%arg0: i32) -> (i32, i32, i32) {
    %c0_i32 = arith.constant 0 : i32
    %c0_i32_0 = arith.constant 0 : i32
    %c0_i32_1 = arith.constant 0 : i32
    return %arg0, %c0_i32, %c0_i32_0 : i32, i32, i32
  }
  func.func @transform_1(%arg0: i32) -> (i32, i32, i32) {
    %c0_i32 = arith.constant 0 : i32
    %c0_i32_0 = arith.constant 0 : i32
    %c0_i32_1 = arith.constant 0 : i32
    return %arg0, %c0_i32, %c0_i32_0 : i32, i32, i32
  }
  func.func @transform_2(%arg0: i32) -> (i32, i32) {
    %c0_i32 = arith.constant 0 : i32
    %c0_i32_0 = arith.constant 0 : i32
    %c0_i32_1 = arith.constant 0 : i32
    return %c0_i32, %c0_i32_0 : i32, i32
  }
  func.func @transform_3(%arg0: i32) -> (i32, i32) {
    %c0_i32 = arith.constant 0 : i32
    %c0_i32_0 = arith.constant 0 : i32
    %c0_i32_1 = arith.constant 0 : i32
    return %c0_i32, %c0_i32_0 : i32, i32
  }
  func.func @transform_4(%arg0: i32) -> (i32, i32, i32) {
    %c0_i32 = arith.constant 0 : i32
    %c0_i32_0 = arith.constant 0 : i32
    %c0_i32_1 = arith.constant 0 : i32
    return %arg0, %c0_i32, %c0_i32_0 : i32, i32, i32
  }
}

</mosaic_0001>

<bundles_post_ra>
// kernel: tpu_custom_call.1
= control target key start
LH: loop header
LB: loop body
LE: loop exit
PB: predicated region body
PF: predicated region fallthrough
CT: control target
= control target key end

     0   :  { %s3603_s0 = inlined_call_operand.hbm [shape: bf16[6,128,128], index: 0, kind: input, shape index: {}]   ;;  %s3604_s1 = inlined_call_operand.hbm [shape: bf16[6,256,128], index: 1, kind: input, shape index: {}]   ;;  %s3605_s2 = inlined_call_operand.hbm [shape: bf16[128,256], index: 2, kind: input, shape index: {}]   ;;  %s3606_s3 = inlined_call_operand.hbm [shape: f32[2,384], index: 3, kind: input, shape index: {}]   ;;  %s3607_s4 = inlined_call_operand.hbm [shape: f32[3,2,384], index: 4, kind: output, shape index: {}]  }
   0x1   :  { %3611 = sst [smem:[#allocation19_spill]] %s3603_s0 }
   0x2   :  { %3612 = sst [smem:[#allocation20_spill]] %s3605_s2 }
   0x3   :  { %9 = vsyncpa [#allocation6], 0 }
   0x4   :  { %11 = vsyncpa [#allocation6 + $0x1], 0 }
   0x5   :  { %12 = vsyncpa [#allocation9], 0 }
   0x6   :  { %14 = vsyncpa [#allocation9 + $0x1], 0 }
   0x7   :  { %15 = vsyncpa [#allocation12], 0 }
   0x8   :  { %16 = vsyncpa [#allocation7], 0 }
   0x9   :  { %18 = vsyncpa [#allocation7 + $0x1], 0  ;;  %s3012_s15 = smov 0   ;;  %s3014_s16 = smov 0  }
   0xa   :  { %s3016_s17 = smov 0   ;;  %s3018_s18 = smov 0  }
   0xb LB: > { %s3033_s19 = sadd.s32 4294967295, %s2975_s18   ;;  %s2151_s20 = sadd.s32 4294967294, %s2975_s18   ;;  %s2975_s18 = sphi %s3018_s18, %s3632_s18   ;;  %s2971_s17 = sphi %s3016_s17, %s3631_s17   ;;  %s2967_s16 = sphi %s3014_s16, %s3630_s16   ;;  %s2963_s15 = sphi %s3012_s15, %s3629_s15  }
   0xc   : > { %p44_p0 = scmp.ne.s32.totalorder %s2967_s16, %s2963_s15  ;;  %p3608_p1 = scmp.eq.s32.totalorder %s3033_s19, 0 }
   0xd   : > { %p142_p3 = scmp.eq.s32.totalorder %s2151_s20, 2  ;;  %p2152_p5 = scmp.ge.s32.totalorder %s2975_s18, 1 }
   0xe   : > { %p3042_p4 = por %p3608_p1, %p44_p0  ;;  %p149_p7 = scmp.lt.s32.totalorder %s2975_s18, 4 }
   0xf   : > { %p3047_p6 = por %p142_p3, %p44_p0  ;;  %s2977_s24 = smov [#allocation10]  }
  0x10   : > { %s3613_s21 = scalar_select %p3042_p4, 1, 0 }
  0x11   : > { %s3614_s22 = scalar_select %p3047_p6, 1, 0 }
  0x12   : > { %p3052_p8 = pnand %p2152_p5, %p149_p7  ;;  %s161_s25 = sshll.u32 %s2977_s24, 4  ;;  %s162_s25 = int_to_ptr.vmem [resolvable:$true] %s161_s25 }
  0x13   : > { %s2978_s27 = smov [#allocation11]   ;;  %s2802_s29 = scalar_lea.vmem %s162_s25, 2048 }
  0x14   : > { %p2644_p9 = pneg %p3052_p8  ;;  %s175_s28 = sshll.u32 %s2978_s27, 4  ;;  %s176_s28 = int_to_ptr.vmem [resolvable:$true] %s175_s28 }
  0x15   : > { %p2803_p12 = scmp.ne.s32.totalorder %s162_s25, %s2802_s29  ;;  %p2810_p3 = scmp.lt.s32.totalorder %s162_s25, %s162_s25 }
  0x16   : > { %p3060_p10 = pnand %p2644_p9, %p3608_p1  ;;  %p2811_p5 = scmp.lt.s32.totalorder %s2802_s29, %s2802_s29 }
  0x18   : > { %p2793_p11 = pneg %p3060_p10  ;;  %p2812_p7 = por %p2811_p5, %p2810_p3 }
  0x1a   : > { %p2805_p13 = pnand %p2803_p12, %p2793_p11 }
  0x1c   : > { %p2806_p0 = pneg %p2805_p13 }
  0x1e   : > { %p2813_p9 = pnand %p2812_p7, %p2806_p0 }
  0x20   : > { %2816 = shalt.err (!%p2813_p9)
}
  0x21   : > { %s2979_s30 = smov 128   ;;  %s2980_s5 = smov 8  }
  0x22   : > { %s3617_s2 = sld [smem:[#allocation20_spill]]  ;;  %s2828_s8 = scalar_lea.vmem %s176_s28, 96 }
  0x23   : > { %p2829_p1 = scmp.ne.s32.totalorder %s176_s28, %s2828_s8  ;;  %p2836_p2 = scmp.lt.s32.totalorder %s176_s28, %s176_s28 }
  0x24   : > { %p2837_p6 = scmp.lt.s32.totalorder %s2828_s8, %s2828_s8 }
  0x25   : > { %p2831_p12 = pnand %p2829_p1, %p2793_p11 }
  0x26   : > { %p2838_p3 = por %p2837_p6, %p2836_p2 }
  0x27   : > { %p2832_p13 = pneg %p2831_p12 }
  0x28   : > { %2647 = dma.hbm_to_vmem [thread:$0]  (!%p3060_p10), %s3617_s2, 2048, %s162_s25, [#allocation9], %s2979_s30, %s2979_s30, %s2980_s5  }
  0x29   : > { %p2839_p0 = pnand %p2838_p3, %p2832_p13 }
  0x2b   : > { %2842 = shalt.err (!%p2839_p0)
}
  0x2c   : > { %2650 = dma.hbm_to_vmem [thread:$0]  (!%p3060_p10), %s3606_s3, 96, %s176_s28, [#allocation12]  }
  0x2d   : > { %s3083_s11 = sadd.s32 1, %s2975_s18   ;;  %s31_s12 = sadd.s32 1, %s2971_s17 }
  0x2e   : > { %s28_s13 = ssub.s32 %s2975_s18, %s3083_s11  ;;  %p38_p1 = scmp.ne.s32.totalorder %s2971_s17, %s2967_s16 }
  0x2f   : > { %p29_p2 = scmp.eq.s32.totalorder %s28_s13, 0  ;;  %p39_p6 = scmp.eq.s32.totalorder %s2975_s18, 0 }
  0x30   : > { %p3618_p11 = scmp.eq.s32.totalorder %s3033_s19, 2  ;;  %p2664_p7 = scmp.lt.s32.totalorder %s2975_s18, 3 }
  0x31   : > { %s3099_s20 = scalar_select %p29_p2, %s2971_s17, %s31_s12  }
  0x32   : > { %p3093_p5 = por %p3618_p11, %p38_p1  ;;  %p40_p9 = por %p39_p6, %p38_p1 }
  0x33   : > { %s3102_s24 = sand.u32 1, %s2971_s17   ;;  %s2301_s26 = sshll.u32 %s2975_s18, 11 }
  0x34   : > { %s3619_s14 = scalar_select %p3093_p5, 1, 0 }
  0x35   : > { %s2156_s25 = sshll.u32 %s3102_s24, 7  ;;  %s3620_s0 = sld [smem:[#allocation19_spill]] }
  0x36   : > { %s190_s30 = scalar_lea.vmem [#allocation5], %s2156_s25  ;;  %p3113_p10 = pnand %p2664_p7, %p40_p9 }
  0x37   : > { %s198_s5 = sshll.u32 %s190_s30, 4  ;;  %s208_s7 = sand.u32 1, %s2975_s18   ;;  %s3111_s5 = int_to_ptr.vmem [resolvable:$true] %s198_s5 }
  0x38   : > { %s187_s8 = scalar_lea.sflag [#allocation6], %s3102_s24  ;;  %p2845_p13 = pneg %p3113_p10 }
  0x3b   : > { %s3109_s29 = scalar_lea.hbm %s3620_s0, %s2301_s26  ;;  %s2848_s13 = scalar_lea.hbm %s3620_s0, 6144 }
  0x3c   : > { %s2843_s9 = scalar_lea.hbm %s3109_s29, 2048  ;;  %p2849_p1 = scmp.lt.s32.totalorder %s3109_s29, %s3620_s0 }
  0x3d   : > { %p2844_p12 = scmp.ne.s32.totalorder %s3109_s29, %s2843_s9  ;;  %p2850_p2 = scmp.lt.s32.totalorder %s2848_s13, %s2843_s9 }
  0x3f   : > { %p2846_p3 = pnand %p2845_p13, %p2844_p12  ;;  %p2851_p6 = por %p2850_p2, %p2849_p1 }
  0x41   : > { %p2847_p0 = pneg %p2846_p3 }
  0x43   : > { %p2852_p11 = pnand %p2851_p6, %p2847_p0 }
  0x45   : > { %2855 = shalt.err (!%p2852_p11)
}
  0x46   : > { %s2856_s27 = scalar_lea.vmem %s3111_s5, 2048  ;;  %s2981_s28 = smov [#allocation5]  }
  0x47   : > { %p2857_p7 = scmp.ne.s32.totalorder %s3111_s5, %s2856_s27  ;;  %s2861_s30 = sshll.u32 %s2981_s28, 4  ;;  %s2862_s30 = int_to_ptr.vmem [resolvable:$false] %s2861_s30 }
  0x48   : > { %s2863_s10 = scalar_lea.vmem %s2862_s30, 4096  ;;  %p2864_p3 = scmp.lt.s32.totalorder %s3111_s5, %s2862_s30 }
  0x49   : > { %p2859_p9 = pnand %p2857_p7, %p2845_p13  ;;  %p2865_p5 = scmp.lt.s32.totalorder %s2863_s10, %s2856_s27 }
  0x4b   : > { %p2860_p12 = pneg %p2859_p9  ;;  %p2866_p4 = por %p2865_p5, %p2864_p3 }
  0x4d   : > { %p2867_p1 = pnand %p2866_p4, %p2860_p12 }
  0x4f   : > { %2870 = shalt.err (!%p2867_p1)
}
  0x50   : > { %s2982_s9 = smov 64   ;;  %s2983_s12 = smov 4  }
  0x51   : > { %2654 = dma.hbm_to_vmem [thread:$0]  (!%p3113_p10), %s3109_s29, 2048, %s3111_s5, %s187_s8, %s2982_s9, %s2982_s9, %s2983_s12  }
  0x52   : > { %s2160_s13 = sshll.u32 %s3102_s24, 8  ;;  %s2303_s25 = sshll.u32 %s2975_s18, 12 }
  0x53   : > { %s3153_s28 = scalar_lea.hbm %s3604_s1, %s2303_s25  ;;  %s212_s30 = scalar_lea.vmem [#allocation8], %s2160_s13 }
  0x54   : > { %s220_s10 = sshll.u32 %s212_s30, 4  ;;  %s209_s0 = scalar_lea.sflag [#allocation9], %s208_s7  ;;  %s3155_s10 = int_to_ptr.vmem [resolvable:$true] %s220_s10 }
  0x55   : > { %s2871_s2 = scalar_lea.hbm %s3153_s28, 4096  ;;  %s2876_s5 = scalar_lea.hbm %s3604_s1, 12288 }
  0x56   : > { %p2872_p4 = scmp.ne.s32.totalorder %s3153_s28, %s2871_s2  ;;  %p2877_p2 = scmp.lt.s32.totalorder %s3153_s28, %s3604_s1 }
  0x57   : > { %p2878_p6 = scmp.lt.s32.totalorder %s2876_s5, %s2871_s2 }
  0x58   : > { %p2874_p5 = pnand %p2872_p4, %p2845_p13 }
  0x59   : > { %p2879_p11 = por %p2878_p6, %p2877_p2 }
  0x5a   : > { %p2875_p0 = pneg %p2874_p5 }
  0x5c   : > { %p2880_p7 = pnand %p2879_p11, %p2875_p0 }
  0x5e   : > { %2883 = shalt.err (!%p2880_p7)
}
  0x5f   : > { %s2884_s7 = scalar_lea.vmem %s3155_s10, 4096  ;;  %s2984_s13 = smov [#allocation8]  }
  0x60   : > { %p2885_p9 = scmp.ne.s32.totalorder %s3155_s10, %s2884_s7  ;;  %s2889_s26 = sshll.u32 %s2984_s13, 4  ;;  %s2890_s26 = int_to_ptr.vmem [resolvable:$false] %s2889_s26 }
  0x61   : > { %s2891_s27 = scalar_lea.vmem %s2890_s26, 8192  ;;  %p2892_p1 = scmp.lt.s32.totalorder %s3155_s10, %s2890_s26 }
  0x62   : > { %p2887_p12 = pnand %p2885_p9, %p2845_p13  ;;  %p2893_p4 = scmp.lt.s32.totalorder %s2891_s27, %s2884_s7 }
  0x64   : > { %p2888_p3 = pneg %p2887_p12  ;;  %p2894_p5 = por %p2893_p4, %p2892_p1 }
  0x66   : > { %p2895_p2 = pnand %p2894_p5, %p2888_p3 }
  0x68   : > { %2898 = shalt.err (!%p2895_p2)
}
  0x69   : > { %2657 = dma.hbm_to_vmem [thread:$0]  (!%p3113_p10), %s3153_s28, 4096, %s3155_s10, %s209_s0, %s2982_s9, %s2982_s9, %s2983_s12  }
  0x6a   : > { %232 = sbr.rel (%p3052_p8) target bundleno = 819 (0x333), region = 36  ;;  %s3187_s2 = sand.u32 (!%p3052_p8), 1, %s2967_s16  }
  0x6b   : > { %s2165_s30 = sshll.u32 (!%p3052_p8), %s3187_s2, 7  ;;  %s235_s24 = scalar_lea.sflag (!%p3052_p8), [#allocation6], %s3187_s2 }
  0x6c   : > { %s3191_s29 = scalar_lea.vmem (!%p3052_p8), [#allocation5], %s2165_s30  ;;  %p3622_p13 = scmp.ne.s32.totalorder (!%p3052_p8), %s3613_s21, 0 }
  0x6f   : > { %2942 = dma.done.wait (%p3622_p13), %s235_s24, 2048  }
  0x70   : > { %2944 = vsyncadd (%p3622_p13), %s235_s24, 4294965248  ;;  %s243_s0 = sand.u32 1, %s3033_s19   ;;  %s2166_s23 = sshll.u32 %s3187_s2, 8 }
  0x71   : > { %s244_s6 = scalar_lea.sflag [#allocation9], %s243_s0  ;;  %s3199_s9 = scalar_lea.vmem [#allocation8], %s2166_s23 }
  0x72   : > { %2946 = dma.done.wait (%p3622_p13), %s244_s6, 4096  }
  0x73   : > { %2948 = vsyncadd (%p3622_p13), %s244_s6, 4294963200  ;;  %p3623_p8 = scmp.eq.s32.totalorder %s3033_s19, 0 }
  0x75   : > { %2950 = dma.done.wait (%p3623_p8), [#allocation9], 2048   ;;  %p3624_p10 = pmov %p3623_p8 }
  0x76   : > { %p3625_p0 = pmov %p3623_p8 }
  0x77   : > { %2952 = vsyncadd (%p3624_p10), [#allocation9], 4294965248 }
  0x78   : > { %2954 = dma.done.wait (%p3625_p0), [#allocation12], 96   ;;  %p3626_p6 = pmov %p3625_p0 }
  0x79   : > { %v2337_v0 = vld [vmem:[%s3199_s9] sm:$0xff]   ;;  %v301_v1 = vld [vmem:[%s3199_s9 + $0x38] sm:$0xf]  ;;  %v302_v2 = vld [vmem:[%s3199_s9 + $0x3c] sm:$0xf]  ;;  %vm1185_vm0 = vcmask 7168  }
  0x7a   : > { %2956 = vsyncadd (%p3626_p6), [#allocation12], 4294967200  ;;  %v2338_v3 = vunpack.c.l.bf16 %v2337_v0  ;;  %333 = vst [vmem:[#allocation2 + $0x70] sm:$0xf] %v301_v1  ;;  %v2183_v4 = vld [vmem:[%s3199_s9 + $0xb8] sm:$0xf]  ;;  %v2339_v7 = vunpack.c.h.bf16 %v2337_v0 }
  0x7b   : > { %334 = vst [vmem:[#allocation2 + $0x78] sm:$0xf] %v302_v2  ;;  %v2184_v5 = vld [vmem:[%s3199_s9 + $0xbc] sm:$0xf]  ;;  %v2503_v6 = vld [vmem:[%s3199_s9 + $0x8] sm:$0xff]   ;;  %v2504_v18 = vld [vmem:[%s3199_s9 + $0x10] sm:$0xff]  }
  0x7c   : > { %398 = vst [vmem:[#allocation2 + $0x74] sm:$0xf] %v2183_v4  ;;  %399 = vst [vmem:[#allocation2 + $0x7c] sm:$0xf] %v2184_v5  ;;  %v2342_v8 = vunpack.c.l.bf16 %v2503_v6  ;;  %v299_v9 = vld [vmem:[%s3199_s9 + $0x30] sm:$0xf]  ;;  %v2343_v12 = vunpack.c.h.bf16 %v2503_v6  ;;  %v2346_v22 = vunpack.c.l.bf16 %v2504_v18  ;;  %v2347_v26 = vunpack.c.h.bf16 %v2504_v18 }
  0x7d   : > { %v300_v10 = vld [vmem:[%s3199_s9 + $0x34] sm:$0xf]  ;;  %v2181_v11 = vld [vmem:[%s3199_s9 + $0xb0] sm:$0xf]  ;;  %v993_v13 = vmax.f32 %v2338_v3, 1e-06 }
  0x7e   : > { %v994_v14 = vmax.f32 %v2339_v7, 1e-06  ;;  %331 = vst [vmem:[#allocation2 + $0x60] sm:$0xf] %v299_v9  ;;  %332 = vst [vmem:[#allocation2 + $0x68] sm:$0xf] %v300_v10 }
  0x7f   : > { %v2182_v15 = vld [vmem:[%s3199_s9 + $0xb4] sm:$0xf]  ;;  %396 = vst [vmem:[#allocation2 + $0x64] sm:$0xf] %v2181_v11  ;;  %v995_v16 = vmax.f32 %v2342_v8, 1e-06  ;;  %v1025_v20 = vmul.f32 %v993_v13, %v993_v13 }
  0x80   : > { %397 = vst [vmem:[#allocation2 + $0x6c] sm:$0xf] %v2182_v15  ;;  %v996_v17 = vmax.f32 %v2343_v12, 1e-06  ;;  %v2505_v19 = vld [vmem:[%s3199_s9 + $0x18] sm:$0xff]   ;;  %v1026_v21 = vmul.f32 %v994_v14, %v994_v14  ;;  %v2506_v48 = vld [vmem:[%s3199_s9 + $0x20] sm:$0xff]  }
  0x81   : > { %v297_v23 = vld [vmem:[%s3199_s9 + $0x28] sm:$0xf]  ;;  %v298_v24 = vld [vmem:[%s3199_s9 + $0x2c] sm:$0xf]  ;;  %v1027_v27 = vmul.f32 %v995_v16, %v995_v16  ;;  %v2350_v30 = vunpack.c.l.bf16 %v2505_v19  ;;  %v295_v31 = vld [vmem:[%s3199_s9 + $0x20] sm:$0xf]  ;;  %v2351_v33 = vunpack.c.h.bf16 %v2505_v19  ;;  %v1057_v34 = vmul.f32 %v1025_v20, %v993_v13 }
  0x82   : > { %v2179_v25 = vld [vmem:[%s3199_s9 + $0xa8] sm:$0xf]  ;;  %v1028_v28 = vmul.f32 %v996_v17, %v996_v17  ;;  %329 = vst [vmem:[#allocation2 + $0x50] sm:$0xf] %v297_v23  ;;  %330 = vst [vmem:[#allocation2 + $0x58] sm:$0xf] %v298_v24  ;;  %v1058_v41 = vmul.f32 %v1026_v21, %v994_v14  ;;  %v2354_v51 = vunpack.c.l.bf16 %v2506_v48  ;;  %v2355_v52 = vunpack.c.h.bf16 %v2506_v48 }
  0x83   : > { %v2180_v29 = vld [vmem:[%s3199_s9 + $0xac] sm:$0xf]  ;;  %394 = vst [vmem:[#allocation2 + $0x54] sm:$0xf] %v2179_v25  ;;  %v296_v32 = vld [vmem:[%s3199_s9 + $0x24] sm:$0xf]  ;;  %v1059_v38 = vmul.f32 %v1027_v27, %v995_v16  ;;  %1089 = vadd.xlane.f32.xlu0 %v1057_v34 }
  0x84   : > { %v997_v35 = vmax.f32 %v2346_v22, 1e-06  ;;  %395 = vst [vmem:[#allocation2 + $0x5c] sm:$0xf] %v2180_v29  ;;  %v998_v36 = vmax.f32 %v2347_v26, 1e-06  ;;  %v1060_v45 = vmul.f32 %v1028_v28, %v996_v17 }
  0x85   : > { %327 = vst [vmem:[#allocation2 + $0x40] sm:$0xf] %v295_v31  ;;  %328 = vst [vmem:[#allocation2 + $0x48] sm:$0xf] %v296_v32  ;;  %v2177_v37 = vld [vmem:[%s3199_s9 + $0xa0] sm:$0xf]  ;;  %1093 = vadd.xlane.f32.xlu1 %v1059_v38 }
  0x86   : > { %v2178_v39 = vld [vmem:[%s3199_s9 + $0xa4] sm:$0xf]  ;;  %392 = vst [vmem:[#allocation2 + $0x44] sm:$0xf] %v2177_v37  ;;  %v2707_v40 = vld [vmem:[#allocation2 + $0x74] ss:$8 sps:$4 sm:$0xff]   ;;  %v1029_v42 = vmul.f32 %v997_v35, %v997_v35  ;;  %v1030_v46 = vmul.f32 %v998_v36, %v998_v36 }
  0x87   : > { %v999_v43 = vmax.f32 %v2350_v30, 1e-06  ;;  %393 = vst [vmem:[#allocation2 + $0x4c] sm:$0xf] %v2178_v39  ;;  %v2709_v44 = vld [vmem:[#allocation2 + $0x70] ss:$8 sps:$4 sm:$0xff]   ;;  %704 = vmatprep.subr.bf16.mxu0 %v2707_v40  ;;  %2542 = vmatprep.subr.bf16.mxu1 %v2707_v40 }
  0x88   : > { %v1000_v47 = vmax.f32 %v2351_v33, 1e-06  ;;  %v2710_v49 = vld [vmem:[#allocation2 + $0x64] ss:$8 sps:$4 sm:$0xff]   ;;  %v2712_v50 = vld [vmem:[#allocation2 + $0x60] ss:$8 sps:$4 sm:$0xff]   ;;  %705 = vmatpush1.bf16.msra.mxu0 %v2709_v44  ;;  %2558 = vmatpush1.bf16.msra.mxu1 %v2709_v44  ;;  %v1061_v56 = vmul.f32 %v1029_v42, %v997_v35  ;;  %v1062_v62 = vmul.f32 %v1030_v46, %v998_v36 }
  0x89   : > { %v293_v53 = vld [vmem:[%s3199_s9 + $0x18] sm:$0xf]  ;;  %v294_v54 = vld [vmem:[%s3199_s9 + $0x1c] sm:$0xf]  ;;  %1091 = vadd.xlane.f32.xlu0 %v1058_v41  ;;  %706 = vmatprep.subr.bf16.mxu0 %v2710_v49  ;;  %v1031_v57 = vmul.f32 %v999_v43, %v999_v43  ;;  %v1001_v58 = vmax.f32 %v2354_v51, 1e-06 }
  0x8a   : > { %v2175_v55 = vld [vmem:[%s3199_s9 + $0x98] sm:$0xf]  ;;  %325 = vst [vmem:[#allocation2 + $0x30] sm:$0xf] %v293_v53  ;;  %326 = vst [vmem:[#allocation2 + $0x38] sm:$0xf] %v294_v54  ;;  %1095 = vadd.xlane.f32.xlu1 %v1060_v45  ;;  %2543 = vmatprep.subr.bf16.mxu1 %v2710_v49  ;;  %v1032_v63 = vmul.f32 %v1000_v47, %v1000_v47 }
  0x8b   : > { %v2176_v59 = vld [vmem:[%s3199_s9 + $0x9c] sm:$0xf]  ;;  %390 = vst [vmem:[#allocation2 + $0x34] sm:$0xf] %v2175_v55  ;;  %v2507_v60 = vld [vmem:[%s3199_s9 + $0x28] sm:$0xff]   ;;  %v2508_v4 = vld [vmem:[%s3199_s9 + $0x30] sm:$0xff]   ;;  %v1063_v8 = vmul.f32 %v1031_v57, %v999_v43  ;;  %v1033_v9 = vmul.f32 %v1001_v58, %v1001_v58 }
  0x8c   : > { %v2713_v61 = vld [vmem:[#allocation2 + $0x54] ss:$8 sps:$4 sm:$0xff]   ;;  %391 = vst [vmem:[#allocation2 + $0x3c] sm:$0xf] %v2176_v59  ;;  %v2358_v0 = vunpack.c.l.bf16 %v2507_v60  ;;  %v2359_v1 = vunpack.c.h.bf16 %v2507_v60  ;;  %v1002_v2 = vmax.f32 %v2355_v52, 1e-06  ;;  %707 = vmatpush1.bf16.msra.mxu0 %v2712_v50  ;;  %2559 = vmatpush1.bf16.msra.mxu1 %v2712_v50  ;;  %v2362_v7 = vunpack.c.l.bf16 %v2508_v4 }
  0x8d   : > { %v291_v3 = vld [vmem:[%s3199_s9 + $0x10] sm:$0xf]  ;;  %1097 = vadd.xlane.f32.xlu0 %v1061_v56  ;;  %708 = vmatprep.subr.bf16.mxu0 %v2713_v61  ;;  %v292_v11 = vld [vmem:[%s3199_s9 + $0x14] sm:$0xf]  ;;  %v2363_v13 = vunpack.c.h.bf16 %v2508_v4  ;;  %v2718_v14 = vld [vmem:[#allocation2 + $0x40] ss:$8 sps:$4 sm:$0xff]   ;;  %v1064_v15 = vmul.f32 %v1032_v63, %v1000_v47  ;;  %v1065_v25 = vmul.f32 %v1033_v9, %v1001_v58 }
  0x8e   : > { %v2715_v5 = vld [vmem:[#allocation2 + $0x50] ss:$8 sps:$4 sm:$0xff]   ;;  %v2716_v6 = vld [vmem:[#allocation2 + $0x44] ss:$8 sps:$4 sm:$0xff]   ;;  %323 = vst [vmem:[#allocation2 + $0x20] sm:$0xf] %v291_v3  ;;  %1099 = vadd.xlane.f32.xlu1 %v1062_v62  ;;  %2544 = vmatprep.subr.bf16.mxu1 %v2713_v61  ;;  %v1034_v16 = vmul.f32 %v1002_v2, %v1002_v2 }
  0x8f   : > { %v1003_v10 = vmax.f32 %v2358_v0, 1e-06  ;;  %v2173_v12 = vld [vmem:[%s3199_s9 + $0x90] sm:$0xf]  ;;  %324 = vst [vmem:[#allocation2 + $0x28] sm:$0xf] %v292_v11 }
  0x90   : > { %v2174_v17 = vld [vmem:[%s3199_s9 + $0x94] sm:$0xf]  ;;  %388 = vst [vmem:[#allocation2 + $0x24] sm:$0xf] %v2173_v12  ;;  %v1004_v18 = vmax.f32 %v2359_v1, 1e-06  ;;  %709 = vmatpush1.bf16.msra.mxu0 %v2715_v5  ;;  %2560 = vmatpush1.bf16.msra.mxu1 %v2715_v5  ;;  %v1066_v30 = vmul.f32 %v1034_v16, %v1002_v2 }
  0x91   : > { %389 = vst [vmem:[#allocation2 + $0x2c] sm:$0xf] %v2174_v17  ;;  %v289_v19 = vld [vmem:[%s3199_s9 + $0x8] sm:$0xf]  ;;  %v290_v20 = vld [vmem:[%s3199_s9 + $0xc] sm:$0xf]  ;;  %1101 = vadd.xlane.f32.xlu0 %v1063_v8  ;;  %710 = vmatprep.subr.bf16.mxu0 %v2716_v6  ;;  %v1035_v27 = vmul.f32 %v1003_v10, %v1003_v10 }
  0x92   : > { %v2171_v21 = vld [vmem:[%s3199_s9 + $0x88] sm:$0xf]  ;;  %v1005_v22 = vmax.f32 %v2362_v7, 1e-06  ;;  %321 = vst [vmem:[#allocation2 + $0x10] sm:$0xf] %v289_v19  ;;  %1103 = vadd.xlane.f32.xlu1 %v1064_v15  ;;  %2545 = vmatprep.subr.bf16.mxu1 %v2716_v6  ;;  %v1036_v31 = vmul.f32 %v1004_v18, %v1004_v18 }
  0x93   : > { %322 = vst [vmem:[#allocation2 + $0x18] sm:$0xf] %v290_v20  ;;  %v2172_v23 = vld [vmem:[%s3199_s9 + $0x8c] sm:$0xf]  ;;  %386 = vst [vmem:[#allocation2 + $0x14] sm:$0xf] %v2171_v21  ;;  %v1067_v42 = vmul.f32 %v1035_v27, %v1003_v10 }
  0x94   : > { %v2509_v24 = vld [vmem:[%s3199_s9 + $0x38] sm:$0xff]   ;;  %387 = vst [vmem:[#allocation2 + $0x1c] sm:$0xf] %v2172_v23  ;;  %v1006_v28 = vmax.f32 %v2363_v13, 1e-06  ;;  %711 = vmatpush1.bf16.msra.mxu0 %v2718_v14  ;;  %2561 = vmatpush1.bf16.msra.mxu1 %v2718_v14  ;;  %v2510_v39 = vld [vmem:[%s3199_s9 + $0x40] sm:$0xff]   ;;  %v1037_v43 = vmul.f32 %v1005_v22, %v1005_v22  ;;  %v1068_v48 = vmul.f32 %v1036_v31, %v1004_v18 }
  0x95   : > { %v2719_v26 = vld [vmem:[#allocation2 + $0x34] ss:$8 sps:$4 sm:$0xff]   ;;  %v2366_v29 = vunpack.c.l.bf16 %v2509_v24  ;;  %v287_v32 = vld [vmem:[%s3199_s9] sm:$0xf]  ;;  %v288_v33 = vld [vmem:[%s3199_s9 + $0x4] sm:$0xf]  ;;  %v2367_v35 = vunpack.c.h.bf16 %v2509_v24  ;;  %1105 = vadd.xlane.f32.xlu0 %v1065_v25  ;;  %v2370_v44 = vunpack.c.l.bf16 %v2510_v39  ;;  %v2371_v51 = vunpack.c.h.bf16 %v2510_v39 }
  0x96   : > { %v2169_v34 = vld [vmem:[%s3199_s9 + $0x80] sm:$0xf]  ;;  %v2721_v36 = vld [vmem:[#allocation2 + $0x30] ss:$8 sps:$4 sm:$0xff]   ;;  %319 = vst [vmem:[#allocation2] sm:$0xf] %v287_v32  ;;  %712 = vmatprep.subr.bf16.mxu0 %v2719_v26  ;;  %1107 = vadd.xlane.f32.xlu1 %v1066_v30  ;;  %v1038_v49 = vmul.f32 %v1006_v28, %v1006_v28  ;;  %v1069_v56 = vmul.f32 %v1037_v43, %v1005_v22 }
  0x97   : > { %v3252_v37 = vmax.f32 %v2366_v29, 1e-06  ;;  %320 = vst [vmem:[#allocation2 + $0x8] sm:$0xf] %v288_v33  ;;  %v2170_v38 = vld [vmem:[%s3199_s9 + $0x84] sm:$0xf]  ;;  %2546 = vmatprep.subr.bf16.mxu1 %v2719_v26 }
  0x98   : > { %384 = vst [vmem:[#allocation2 + $0x4] sm:$0xf] %v2169_v34  ;;  %385 = vst [vmem:[#allocation2 + $0xc] sm:$0xf] %v2170_v38  ;;  %v317_v40 = vld [vmem:[%s3199_s9 + $0x78] sm:$0xf]  ;;  %713 = vmatpush1.bf16.msra.mxu0 %v2721_v36  ;;  %2562 = vmatpush1.bf16.msra.mxu1 %v2721_v36  ;;  %v1070_v62 = vmul.f32 %v1038_v49, %v1006_v28 }
  0x99   : > { %v318_v41 = vld [vmem:[%s3199_s9 + $0x7c] sm:$0xf]  ;;  %349 = vst [vmem:[#allocation2 + $0xf0] sm:$0xf] %v317_v40  ;;  %v2199_v45 = vld [vmem:[%s3199_s9 + $0xf8] sm:$0xf]  ;;  %1109 = vadd.xlane.f32.xlu0 %v1067_v42  ;;  %v1039_v57 = vmul.f32 %v3252_v37, %v3252_v37 }
  0x9a   : > { %350 = vst [vmem:[#allocation2 + $0xf8] sm:$0xf] %v318_v41  ;;  %v2200_v46 = vld [vmem:[%s3199_s9 + $0xfc] sm:$0xf]  ;;  %v2722_v47 = vld [vmem:[#allocation2 + $0x24] ss:$8 sps:$4 sm:$0xff]   ;;  %1111 = vadd.xlane.f32.xlu1 %v1068_v48 }
  0x9b   : > { %v1008_v50 = vmax.f32 %v2367_v35, 1e-06  ;;  %414 = vst [vmem:[#allocation2 + $0xf4] sm:$0xf] %v2199_v45  ;;  %415 = vst [vmem:[#allocation2 + $0xfc] sm:$0xf] %v2200_v46  ;;  %714 = vmatprep.subr.bf16.mxu0 %v2722_v47  ;;  %2547 = vmatprep.subr.bf16.mxu1 %v2722_v47  ;;  %v1071_v8 = vmul.f32 %v1039_v57, %v3252_v37 }
  0x9c   : > { %v2724_v52 = vld [vmem:[#allocation2 + $0x20] ss:$8 sps:$4 sm:$0xff]   ;;  %v2725_v54 = vld [vmem:[#allocation2 + $0x14] ss:$8 sps:$4 sm:$0xff]   ;;  %v1009_v55 = vmax.f32 %v2370_v44, 1e-06 }
  0x9d   : > { %v2511_v53 = vld [vmem:[%s3199_s9 + $0x48] sm:$0xff]   ;;  %v315_v59 = vld [vmem:[%s3199_s9 + $0x70] sm:$0xf]  ;;  %v316_v60 = vld [vmem:[%s3199_s9 + $0x74] sm:$0xf]  ;;  %v1040_v63 = vmul.f32 %v1008_v50, %v1008_v50  ;;  %715 = vmatpush1.bf16.msra.mxu0 %v2724_v52  ;;  %2563 = vmatpush1.bf16.msra.mxu1 %v2724_v52  ;;  %vm1667_vm1 = vcmask 15368  }
  0x9e   : > { %v2374_v58 = vunpack.c.l.bf16 %v2511_v53  ;;  %v2197_v61 = vld [vmem:[%s3199_s9 + $0xf0] sm:$0xf]  ;;  %v1010_v0 = vmax.f32 %v2371_v51, 1e-06  ;;  %347 = vst [vmem:[#allocation2 + $0xe0] sm:$0xf] %v315_v59  ;;  %v2375_v2 = vunpack.c.h.bf16 %v2511_v53  ;;  %1113 = vadd.xlane.f32.xlu0 %v1069_v56  ;;  %716 = vmatprep.subr.bf16.mxu0 %v2725_v54  ;;  %v1041_v10 = vmul.f32 %v1009_v55, %v1009_v55 }
  0x9f   : > { %348 = vst [vmem:[#allocation2 + $0xe8] sm:$0xf] %v316_v60  ;;  %v2198_v1 = vld [vmem:[%s3199_s9 + $0xf4] sm:$0xf]  ;;  %412 = vst [vmem:[#allocation2 + $0xe4] sm:$0xf] %v2197_v61  ;;  %1115 = vadd.xlane.f32.xlu1 %v1070_v62  ;;  %v1072_v13 = vmul.f32 %v1040_v63, %v1008_v50  ;;  %2548 = vmatprep.subr.bf16.mxu1 %v2725_v54 }
  0xa0   : > { %v2512_v3 = vld [vmem:[%s3199_s9 + $0x50] sm:$0xff]   ;;  %413 = vst [vmem:[#allocation2 + $0xec] sm:$0xf] %v2198_v1  ;;  %v313_v6 = vld [vmem:[%s3199_s9 + $0x68] sm:$0xf]  ;;  %v1042_v14 = vmul.f32 %v1010_v0, %v1010_v0  ;;  %v2513_v21 = vld [vmem:[%s3199_s9 + $0x58] sm:$0xff]   ;;  %v1073_v27 = vmul.f32 %v1041_v10, %v1009_v55 }
  0xa1   : > { %v2378_v4 = vunpack.c.l.bf16 %v2512_v3  ;;  %v2727_v5 = vld [vmem:[#allocation2 + $0x10] ss:$8 sps:$4 sm:$0xff]   ;;  %v314_v7 = vld [vmem:[%s3199_s9 + $0x6c] sm:$0xf]  ;;  %v1011_v11 = vmax.f32 %v2374_v58, 1e-06  ;;  %v2379_v18 = vunpack.c.h.bf16 %v2512_v3  ;;  %v2382_v29 = vunpack.c.l.bf16 %v2513_v21 }
  0xa2   : > { %v2728_v9 = vld [vmem:[#allocation2 + $0x4] ss:$8 sps:$4 sm:$0xff]   ;;  %345 = vst [vmem:[#allocation2 + $0xd0] sm:$0xf] %v313_v6  ;;  %346 = vst [vmem:[#allocation2 + $0xd8] sm:$0xf] %v314_v7  ;;  %717 = vmatpush1.bf16.msra.mxu0 %v2727_v5  ;;  %2564 = vmatpush1.bf16.msra.mxu1 %v2727_v5  ;;  %v1074_v32 = vmul.f32 %v1042_v14, %v1010_v0  ;;  %v2383_v35 = vunpack.c.h.bf16 %v2513_v21 }
  0xa3   : > { %v2730_v12 = vld [vmem:[#allocation2] ss:$8 sps:$4 sm:$0xff]   ;;  %v1012_v15 = vmax.f32 %v2375_v2, 1e-06  ;;  %v2196_v17 = vld [vmem:[%s3199_s9 + $0xec] sm:$0xf]  ;;  %1117 = vadd.xlane.f32.xlu0 %v1071_v8  ;;  %718 = vmatprep.subr.bf16.mxu0 %v2728_v9  ;;  %v1043_v28 = vmul.f32 %v1011_v11, %v1011_v11 }
  0xa4   : > { %v2195_v16 = vld [vmem:[%s3199_s9 + $0xe8] sm:$0xf]  ;;  %v2731_v19 = vld [vmem:[#allocation2 + $0xf4] ss:$8 sps:$4 sm:$0xff]   ;;  %v1013_v20 = vmax.f32 %v2378_v4, 1e-06  ;;  %1119 = vadd.xlane.f32.xlu1 %v1072_v13  ;;  %2549 = vmatprep.subr.bf16.mxu1 %v2728_v9 }
  0xa5   : > { %410 = vst [vmem:[#allocation2 + $0xd4] sm:$0xf] %v2195_v16  ;;  %411 = vst [vmem:[#allocation2 + $0xdc] sm:$0xf] %v2196_v17  ;;  %v311_v22 = vld [vmem:[%s3199_s9 + $0x60] sm:$0xf]  ;;  %v1044_v33 = vmul.f32 %v1012_v15, %v1012_v15  ;;  %v1075_v42 = vmul.f32 %v1043_v28, %v1011_v11 }
  0xa6   : > { %v3276_v23 = vld [vmem:[%s3199_s9 + $0x60] sm:$0xff]   ;;  %343 = vst [vmem:[#allocation2 + $0xc0] sm:$0xf] %v311_v22  ;;  %v309_v30 = vld [vmem:[%s3199_s9 + $0x58] sm:$0xf]  ;;  %719 = vmatpush1.bf16.msra.mxu0 %v2730_v12  ;;  %2565 = vmatpush1.bf16.msra.mxu1 %v2730_v12  ;;  %v1045_v38 = vmul.f32 %v1013_v20, %v1013_v20  ;;  %v2515_v50 = vld [vmem:[%s3199_s9 + $0x68] sm:$0xff]  }
  0xa7   : > { %v312_v24 = vld [vmem:[%s3199_s9 + $0x64] sm:$0xf]  ;;  %v2193_v25 = vld [vmem:[%s3199_s9 + $0xe0] sm:$0xf]  ;;  %v310_v31 = vld [vmem:[%s3199_s9 + $0x5c] sm:$0xf]  ;;  %v2386_v39 = vunpack.c.l.bf16 %v3276_v23  ;;  %1121 = vadd.xlane.f32.xlu0 %v1073_v27  ;;  %720 = vmatprep.subr.bf16.mxu0 %v2731_v19  ;;  %v2387_v44 = vunpack.c.h.bf16 %v3276_v23  ;;  %v1076_v47 = vmul.f32 %v1044_v33, %v1012_v15  ;;  %v2390_v59 = vunpack.c.l.bf16 %v2515_v50 }
  0xa8   : > { %v2194_v26 = vld [vmem:[%s3199_s9 + $0xe4] sm:$0xf]  ;;  %344 = vst [vmem:[#allocation2 + $0xc8] sm:$0xf] %v312_v24  ;;  %408 = vst [vmem:[#allocation2 + $0xc4] sm:$0xf] %v2193_v25  ;;  %1123 = vadd.xlane.f32.xlu1 %v1074_v32  ;;  %2550 = vmatprep.subr.bf16.mxu1 %v2731_v19  ;;  %v1077_v54 = vmul.f32 %v1045_v38, %v1013_v20  ;;  %v2391_v60 = vunpack.c.h.bf16 %v2515_v50 }
  0xa9   : > { %409 = vst [vmem:[#allocation2 + $0xcc] sm:$0xf] %v2194_v26  ;;  %v1014_v34 = vmax.f32 %v2379_v18, 1e-06  ;;  %341 = vst [vmem:[#allocation2 + $0xb0] sm:$0xf] %v309_v30 }
  0xaa   : > { %342 = vst [vmem:[#allocation2 + $0xb8] sm:$0xf] %v310_v31  ;;  %v2733_v36 = vld [vmem:[#allocation2 + $0xf0] ss:$8 sps:$4 sm:$0xff]   ;;  %v2734_v37 = vld [vmem:[#allocation2 + $0xe4] ss:$8 sps:$4 sm:$0xff]  }
  0xab   : > { %v2191_v40 = vld [vmem:[%s3199_s9 + $0xd8] sm:$0xf]  ;;  %v2192_v41 = vld [vmem:[%s3199_s9 + $0xdc] sm:$0xf]  ;;  %v1015_v43 = vmax.f32 %v2382_v29, 1e-06  ;;  %v1046_v48 = vmul.f32 %v1014_v34, %v1014_v34  ;;  %721 = vmatpush2.bf16.msra.mxu0 %v2733_v36  ;;  %2566 = vmatpush2.bf16.msra.mxu1 %v2733_v36 }
  0xac   : > { %406 = vst [vmem:[#allocation2 + $0xb4] sm:$0xf] %v2191_v40  ;;  %407 = vst [vmem:[#allocation2 + $0xbc] sm:$0xf] %v2192_v41  ;;  %v307_v45 = vld [vmem:[%s3199_s9 + $0x50] sm:$0xf]  ;;  %1125 = vadd.xlane.f32.xlu0 %v1075_v42  ;;  %722 = vmatprep.subr.bf16.mxu0 %v2734_v37 }
  0xad   : > { %v308_v46 = vld [vmem:[%s3199_s9 + $0x54] sm:$0xf]  ;;  %v1016_v49 = vmax.f32 %v2383_v35, 1e-06  ;;  %339 = vst [vmem:[#allocation2 + $0xa0] sm:$0xf] %v307_v45  ;;  %v1047_v57 = vmul.f32 %v1015_v43, %v1015_v43  ;;  %1127 = vadd.xlane.f32.xlu1 %v1076_v47  ;;  %v1078_v62 = vmul.f32 %v1046_v48, %v1014_v34  ;;  %2551 = vmatprep.subr.bf16.mxu1 %v2734_v37 }
  0xae   : > { %340 = vst [vmem:[#allocation2 + $0xa8] sm:$0xf] %v308_v46  ;;  %v2189_v51 = vld [vmem:[%s3199_s9 + $0xd0] sm:$0xf]  ;;  %v2190_v52 = vld [vmem:[%s3199_s9 + $0xd4] sm:$0xf] }
  0xaf   : > { %v2736_v53 = vld [vmem:[#allocation2 + $0xe0] ss:$8 sps:$4 sm:$0xff]   ;;  %v1017_v55 = vmax.f32 %v2386_v39, 1e-06  ;;  %404 = vst [vmem:[#allocation2 + $0xa4] sm:$0xf] %v2189_v51  ;;  %v1048_v63 = vmul.f32 %v1016_v49, %v1016_v49  ;;  %v1079_v8 = vmul.f32 %v1047_v57, %v1015_v43 }
  0xb0   : > { %405 = vst [vmem:[#allocation2 + $0xac] sm:$0xf] %v2190_v52  ;;  %v2737_v56 = vld [vmem:[#allocation2 + $0xd4] ss:$8 sps:$4 sm:$0xff]   ;;  %v1018_v58 = vmax.f32 %v2387_v44, 1e-06  ;;  %723 = vmatpush2.bf16.msra.mxu0 %v2736_v53  ;;  %2567 = vmatpush2.bf16.msra.mxu1 %v2736_v53 }
  0xb1   : > { %v2516_v61 = vld [vmem:[%s3199_s9 + $0x70] sm:$0xff]   ;;  %v305_v0 = vld [vmem:[%s3199_s9 + $0x48] sm:$0xf]  ;;  %v306_v1 = vld [vmem:[%s3199_s9 + $0x4c] sm:$0xf]  ;;  %v1049_v7 = vmul.f32 %v1017_v55, %v1017_v55  ;;  %1129 = vadd.xlane.f32.xlu0 %v1077_v54  ;;  %724 = vmatprep.subr.bf16.mxu0 %v2737_v56  ;;  %v1080_v13 = vmul.f32 %v1048_v63, %v1016_v49  ;;  %s2574_s21 = smul.u32 6, %s3187_s2 }
  0xb2   : > { %v2187_v2 = vld [vmem:[%s3199_s9 + $0xc8] sm:$0xf]  ;;  %337 = vst [vmem:[#allocation2 + $0x90] sm:$0xf] %v305_v0  ;;  %338 = vst [vmem:[#allocation2 + $0x98] sm:$0xf] %v306_v1  ;;  %v2394_v12 = vunpack.c.l.bf16 %v2516_v61  ;;  %1131 = vadd.xlane.f32.xlu1 %v1078_v62  ;;  %2552 = vmatprep.subr.bf16.mxu1 %v2737_v56  ;;  %v1050_v14 = vmul.f32 %v1018_v58, %v1018_v58  ;;  %v2395_v15 = vunpack.c.h.bf16 %v2516_v61 }
  0xb3   : > { %v2188_v3 = vld [vmem:[%s3199_s9 + $0xcc] sm:$0xf]  ;;  %402 = vst [vmem:[#allocation2 + $0x94] sm:$0xf] %v2187_v2  ;;  %v303_v4 = vld [vmem:[%s3199_s9 + $0x40] sm:$0xf]  ;;  %v1081_v21 = vmul.f32 %v1049_v7, %v1017_v55 }
  0xb4   : > { %v304_v5 = vld [vmem:[%s3199_s9 + $0x44] sm:$0xf]  ;;  %v2739_v6 = vld [vmem:[#allocation2 + $0xd0] ss:$8 sps:$4 sm:$0xff]   ;;  %403 = vst [vmem:[#allocation2 + $0x9c] sm:$0xf] %v2188_v3  ;;  %v1082_v26 = vmul.f32 %v1050_v14, %v1018_v58 }
  0xb5   : > { %335 = vst [vmem:[#allocation2 + $0x80] sm:$0xf] %v303_v4  ;;  %336 = vst [vmem:[#allocation2 + $0x88] sm:$0xf] %v304_v5  ;;  %v2740_v9 = vld [vmem:[#allocation2 + $0xc4] ss:$8 sps:$4 sm:$0xff]   ;;  %725 = vmatpush2.bf16.msra.mxu0 %v2739_v6  ;;  %2568 = vmatpush2.bf16.msra.mxu1 %v2739_v6 }
  0xb6   : > { %v1019_v10 = vmax.f32 %v2390_v59, 1e-06  ;;  %v1020_v11 = vmax.f32 %v2391_v60, 1e-06  ;;  %v2517_v16 = vld [vmem:[%s3199_s9 + $0x78] sm:$0xff]   ;;  %1133 = vadd.xlane.f32.xlu0 %v1079_v8  ;;  %726 = vmatprep.subr.bf16.mxu0 %v2740_v9  ;;  %v2526_v30 = vld [vmem:[%s3199_s9 + $0x80] sm:$0xff]  }
  0xb7   : > { %v2185_v17 = vld [vmem:[%s3199_s9 + $0xc0] sm:$0xf]  ;;  %v2186_v18 = vld [vmem:[%s3199_s9 + $0xc4] sm:$0xf]  ;;  %v2743_v20 = vld [vmem:[#allocation2 + $0xb4] ss:$8 sps:$4 sm:$0xff]   ;;  %v2398_v24 = vunpack.c.l.bf16 %v2517_v16  ;;  %1135 = vadd.xlane.f32.xlu1 %v1080_v13  ;;  %2553 = vmatprep.subr.bf16.mxu1 %v2740_v9  ;;  %v2399_v29 = vunpack.c.h.bf16 %v2517_v16  ;;  %v2434_v36 = vunpack.c.l.bf16 %v2526_v30  ;;  %v2435_v41 = vunpack.c.h.bf16 %v2526_v30 }
  0xb8   : > { %400 = vst [vmem:[#allocation2 + $0x84] sm:$0xf] %v2185_v17  ;;  %401 = vst [vmem:[#allocation2 + $0x8c] sm:$0xf] %v2186_v18  ;;  %v2742_v19 = vld [vmem:[#allocation2 + $0xc0] ss:$8 sps:$4 sm:$0xff]   ;;  %v1051_v22 = vmul.f32 %v1019_v10, %v1019_v10  ;;  %v1052_v27 = vmul.f32 %v1020_v11, %v1020_v11 }
  0xb9   : > { %v1021_v23 = vmax.f32 %v2394_v12, 1e-06  ;;  %v2757_v25 = vld [vmem:[#allocation10 + $0x4] ss:$8 sps:$4 sm:$0xff]   ;;  %v1022_v28 = vmax.f32 %v2395_v15, 1e-06  ;;  %727 = vmatpush2.bf16.msra.mxu0 %v2742_v19  ;;  %2569 = vmatpush2.bf16.msra.mxu1 %v2742_v19 }
  0xba   : > { %736 = vmatprep.mubr.bf16.mxu0 %v2757_v25  ;;  %v2745_v31 = vld [vmem:[#allocation2 + $0xb0] ss:$8 sps:$4 sm:$0xff]   ;;  %1137 = vadd.xlane.f32.xlu0 %v1081_v21  ;;  %v1083_v32 = vmul.f32 %v1051_v22, %v1019_v10  ;;  %v2746_v33 = vld [vmem:[#allocation2 + $0xa4] ss:$8 sps:$4 sm:$0xff]   ;;  %v1023_v35 = vmax.f32 %v2398_v24, 1e-06  ;;  %v1084_v38 = vmul.f32 %v1052_v27, %v1020_v11 }
  0xbb   : > { %728 = vmatprep.subr.bf16.mxu0 %v2743_v20  ;;  %v1053_v34 = vmul.f32 %v1021_v23, %v1021_v23  ;;  %v2760_v37 = vld [vmem:[#allocation10 + $0x44] ss:$8 sps:$4 sm:$0xff]   ;;  %1139 = vadd.xlane.f32.xlu1 %v1082_v26  ;;  %v1054_v39 = vmul.f32 %v1022_v28, %v1022_v28  ;;  %v1024_v40 = vmax.f32 %v2399_v29, 1e-06  ;;  %v2748_v43 = vld [vmem:[#allocation2 + $0xa0] ss:$8 sps:$4 sm:$0xff]  }
  0xbc   : > { %2554 = vmatprep.subr.bf16.mxu1 %v2743_v20  ;;  %v2527_v42 = vld [vmem:[%s3199_s9 + $0x88] sm:$0xff]   ;;  %776 = vmatprep.mubr.bf16.mxu1 %v2760_v37  ;;  %v2749_v45 = vld [vmem:[#allocation2 + $0x94] ss:$8 sps:$4 sm:$0xff]   ;;  %v1055_v46 = vmul.f32 %v1023_v35, %v1023_v35  ;;  %v1475_v47 = vmax.f32 %v2434_v36, 1e-06  ;;  %v3307_v8 = vld [vmem:[%s3199_s9 + $0xa0] sm:$0xff]  }
  0xbd   : > { %729 = vmatpush2.bf16.msra.mxu0 %v2745_v31  ;;  %2570 = vmatpush2.bf16.msra.mxu1 %v2745_v31  ;;  %v1085_v44 = vmul.f32 %v1053_v34, %v1021_v23  ;;  %v2438_v48 = vunpack.c.l.bf16 %v2527_v42  ;;  %v1086_v49 = vmul.f32 %v1054_v39, %v1022_v28  ;;  %v1056_v50 = vmul.f32 %v1024_v40, %v1024_v40  ;;  %v2528_v52 = vld [vmem:[%s3199_s9 + $0x90] sm:$0xff]   ;;  %v2529_v63 = vld [vmem:[%s3199_s9 + $0x98] sm:$0xff]   ;;  %v2754_v1 = vld [vmem:[#allocation2 + $0x80] ss:$8 sps:$4 sm:$0xff]   ;;  %s2629_s12 = smul.u32 96, %s3033_s19  ;;  %s284_s28 = scalar_lea.vmem [#allocation13], %s2574_s21 }
  0xbe   : > { %1141 = vadd.xlane.f32.xlu0 %v1083_v32  ;;  %730 = vmatprep.subr.bf16.mxu0 %v2746_v33  ;;  %v1476_v51 = vmax.f32 %v2435_v41, 1e-06  ;;  %v2439_v53 = vunpack.c.h.bf16 %v2527_v42  ;;  %v2751_v54 = vld [vmem:[#allocation2 + $0x90] ss:$8 sps:$4 sm:$0xff]   ;;  %v1087_v55 = vmul.f32 %v1055_v46, %v1023_v35  ;;  %v1507_v57 = vmul.f32 %v1475_v47, %v1475_v47  ;;  %v2755_v11 = vld [vmem:[#allocation10] ss:$8 sps:$4 sm:$0xff]  }
  0xbf   : > { %1143 = vadd.xlane.f32.xlu1 %v1084_v38  ;;  %2555 = vmatprep.subr.bf16.mxu1 %v2746_v33  ;;  %v2752_v56 = vld [vmem:[#allocation2 + $0x84] ss:$8 sps:$4 sm:$0xff]   ;;  %v1477_v58 = vmax.f32 %v2438_v48, 1e-06  ;;  %v2442_v59 = vunpack.c.l.bf16 %v2528_v52  ;;  %v1088_v60 = vmul.f32 %v1056_v50, %v1024_v40  ;;  %v2443_v0 = vunpack.c.h.bf16 %v2528_v52  ;;  %v2758_v12 = vld [vmem:[#allocation10 + $0x40] ss:$8 sps:$4 sm:$0xff]   ;;  %s2037_s25 = scalar_lea.hbm %s3607_s4, %s2629_s12 }
  0xc0   : > { %v1508_v61 = vmul.f32 %v1476_v51, %v1476_v51  ;;  %v1478_v62 = vmax.f32 %v2439_v53, 1e-06  ;;  %v1539_v2 = vmul.f32 %v1507_v57, %v1475_v47  ;;  %v2446_v5 = vunpack.c.l.bf16 %v2529_v63  ;;  %v2761_v13 = vld [vmem:[#allocation10 + $0x14] ss:$8 sps:$4 sm:$0xff]   ;;  %v2534_v19 = vld [vmem:[%s3199_s9 + $0xc0] sm:$0xff]   ;;  %v2535_v30 = vld [vmem:[%s3199_s9 + $0xc8] sm:$0xff]  }
  0xc1   : > { %731 = vmatpush2.bf16.msra.mxu0 %v2748_v43  ;;  %2571 = vmatpush2.bf16.msra.mxu1 %v2748_v43  ;;  %v1509_v3 = vmul.f32 %v1477_v58, %v1477_v58  ;;  %v1479_v4 = vmax.f32 %v2442_v59, 1e-06  ;;  %v1480_v9 = vmax.f32 %v2443_v0, 1e-06  ;;  %v2447_v10 = vunpack.c.h.bf16 %v2529_v63  ;;  %v2764_v14 = vld [vmem:[#allocation10 + $0x54] ss:$8 sps:$4 sm:$0xff]  }
  0xc2   : > { %1145 = vadd.xlane.f32.xlu0 %v1085_v44  ;;  %732 = vmatprep.subr.bf16.mxu0 %v2749_v45  ;;  %v1540_v6 = vmul.f32 %v1508_v61, %v1476_v51  ;;  %v1510_v7 = vmul.f32 %v1478_v62, %v1478_v62  ;;  %v1481_v17 = vmax.f32 %v2446_v5, 1e-06  ;;  %v2450_v18 = vunpack.c.l.bf16 %v3307_v8  ;;  %v3312_v28 = vld [vmem:[%s3199_s9 + $0xe0] sm:$0xff]   ;;  %v2763_v34 = vld [vmem:[#allocation10 + $0x10] ss:$8 sps:$4 sm:$0xff]   ;;  %v3317_v36 = vld [vmem:[%s3199_s9 + $0xa8] sm:$0xff]  }
  0xc3   : > { %1147 = vadd.xlane.f32.xlu1 %v1086_v49  ;;  %2556 = vmatprep.subr.bf16.mxu1 %v2749_v45  ;;  %v1541_v15 = vmul.f32 %v1509_v3, %v1477_v58  ;;  %v1511_v16 = vmul.f32 %v1479_v4, %v1479_v4  ;;  %v1512_v21 = vmul.f32 %v1480_v9, %v1480_v9  ;;  %v1482_v22 = vmax.f32 %v2447_v10, 1e-06  ;;  %v2766_v35 = vld [vmem:[#allocation10 + $0x50] ss:$8 sps:$4 sm:$0xff]   ;;  %v2767_v37 = vld [vmem:[#allocation10 + $0x24] ss:$8 sps:$4 sm:$0xff]  }
  0xc4   : > { %v1542_v20 = vmul.f32 %v1510_v7, %v1478_v62  ;;  %v2466_v23 = vunpack.c.l.bf16 %v2534_v19  ;;  %v1513_v25 = vmul.f32 %v1481_v17, %v1481_v17  ;;  %v1483_v26 = vmax.f32 %v2450_v18, 1e-06  ;;  %v2770_v38 = vld [vmem:[#allocation10 + $0x64] ss:$8 sps:$4 sm:$0xff]   ;;  %v2536_v52 = vld [vmem:[%s3199_s9 + $0xd0] sm:$0xff]   ;;  %s2039_s10 = sshll.u32 %s284_s28, 4  ;;  %s2040_s10 = int_to_ptr.vmem [resolvable:$true] %s2039_s10 }
  0xc5   : > { %733 = vmatpush2.bf16.msra.mxu0 %v2751_v54  ;;  %2572 = vmatpush2.bf16.msra.mxu1 %v2751_v54  ;;  %v1543_v24 = vmul.f32 %v1511_v16, %v1479_v4  ;;  %v2467_v27 = vunpack.c.h.bf16 %v2534_v19  ;;  %v1544_v29 = vmul.f32 %v1512_v21, %v1480_v9  ;;  %v1514_v31 = vmul.f32 %v1482_v22, %v1482_v22  ;;  %v3321_v51 = vld [vmem:[%s3199_s9 + $0xe8] sm:$0xff]   ;;  %v3326_v59 = vld [vmem:[%s3199_s9 + $0xb0] sm:$0xff]   ;;  %v3335_v19 = vld [vmem:[%s3199_s9 + $0xb8] sm:$0xff]   ;;  %s2025_s7 = scalar_lea.sflag [#allocation7], %s3187_s2  ;;  %s2899_s13 = scalar_lea.vmem %s2040_s10, 96 }
  0xc6   : > { %1149 = vadd.xlane.f32.xlu0 %v1087_v55  ;;  %734 = vmatprep.subr.bf16.mxu0 %v2752_v56  ;;  %v1491_v32 = vmax.f32 %v2466_v23, 1e-06  ;;  %v2483_v33 = vunpack.c.h.bf16 %v3312_v28  ;;  %v1545_v39 = vmul.f32 %v1513_v25, %v1481_v17  ;;  %v1515_v40 = vmul.f32 %v1483_v26, %v1483_v26  ;;  %v2769_v57 = vld [vmem:[#allocation10 + $0x20] ss:$8 sps:$4 sm:$0xff]   ;;  %v2776_v61 = vld [vmem:[#allocation10 + $0x74] ss:$8 sps:$4 sm:$0xff]   ;;  %p2900_p11 = scmp.ne.s32.totalorder %s2040_s10, %s2899_s13 }
  0xc7   : > { %1151 = vadd.xlane.f32.xlu1 %v1088_v60  ;;  %2557 = vmatprep.subr.bf16.mxu1 %v2752_v56  ;;  %v1492_v41 = vmax.f32 %v2467_v27, 1e-06  ;;  %v2470_v42 = vunpack.c.l.bf16 %v2535_v30  ;;  %v1546_v43 = vmul.f32 %v1514_v31, %v1482_v22  ;;  %v2454_v46 = vunpack.c.l.bf16 %v3317_v36  ;;  %v2772_v58 = vld [vmem:[#allocation10 + $0x60] ss:$8 sps:$4 sm:$0xff]   ;;  %v2773_v60 = vld [vmem:[#allocation10 + $0x34] ss:$8 sps:$4 sm:$0xff]  }
  0xc8   : > { %v1523_v44 = vmul.f32 %v1491_v32, %v1491_v32  ;;  %v1500_v45 = vmax.f32 %v2483_v33, 1e-06  ;;  %v1547_v47 = vmul.f32 %v1515_v40, %v1483_v26  ;;  %v2471_v50 = vunpack.c.h.bf16 %v2535_v30  ;;  %v2775_v17 = vld [vmem:[#allocation10 + $0x30] ss:$8 sps:$4 sm:$0xff]   ;;  %p3627_p7 = scmp.ne.s32.totalorder %s3619_s14, 0  ;;  %s2986_s26 = smov [#allocation13]  }
  0xc9   : > { %735 = vmatpush2.bf16.msra.mxu0 %v2754_v1  ;;  %2573 = vmatpush2.bf16.msra.mxu1 %v2754_v1  ;;  %v1524_v48 = vmul.f32 %v1492_v41, %v1492_v41  ;;  %v1493_v49 = vmax.f32 %v2470_v42, 1e-06  ;;  %v1485_v55 = vmax.f32 %v2454_v46, 1e-06  ;;  %v2487_v56 = vunpack.c.h.bf16 %v3321_v51  ;;  %v2778_v18 = vld [vmem:[#allocation10 + $0x70] ss:$8 sps:$4 sm:$0xff]  }
  0xca   : > { %1571 = vadd.xlane.f32.xlu0 %v1539_v2  ;;  %v1555_v53 = vmul.f32 %v1523_v44, %v1491_v32  ;;  %v1532_v54 = vmul.f32 %v1500_v45, %v1500_v45  ;;  %v1494_v0 = vmax.f32 %v2471_v50, 1e-06  ;;  %v2474_v1 = vunpack.c.l.bf16 %v2536_v52  ;;  %p2901_p9 = pnand %p2900_p11, %p3627_p7  ;;  %s2903_s27 = sshll.u32 %s2986_s26, 4  ;;  %s2904_s27 = int_to_ptr.vmem [resolvable:$false] %s2903_s27 }
  0xcb   : > { %1573 = vadd.xlane.f32.xlu1 %v1540_v6  ;;  %v1556_v62 = vmul.f32 %v1524_v48, %v1492_v41  ;;  %v1525_v63 = vmul.f32 %v1493_v49, %v1493_v49  ;;  %v1517_v3 = vmul.f32 %v1485_v55, %v1485_v55  ;;  %v1502_v4 = vmax.f32 %v2487_v56, 1e-06  ;;  %s2905_s19 = scalar_lea.vmem %s2904_s27, 192  ;;  %p2906_p3 = scmp.lt.s32.totalorder %s2040_s10, %s2904_s27 }
  0xcc   : > { %737 = vmatmul.mubr.bf16.vlgmr.msra.gmra.mxu0 %v2755_v11  ;;  %777 = vmatmul.mubr.bf16.vlgmr.msra.gmra.mxu1 %v2758_v12  ;;  %v1564_v2 = vmul.f32 %v1532_v54, %v1500_v45  ;;  %v2458_v5 = vunpack.c.l.bf16 %v3326_v59  ;;  %v1526_v7 = vmul.f32 %v1494_v0, %v1494_v0  ;;  %v1495_v9 = vmax.f32 %v2474_v1, 1e-06  ;;  %v3330_v11 = vld [vmem:[%s3199_s9 + $0xf0] sm:$0xff]   ;;  %v2537_v12 = vld [vmem:[%s3199_s9 + $0xd8] sm:$0xff]   ;;  %p2902_p12 = pneg %p2901_p9  ;;  %p2907_p1 = scmp.lt.s32.totalorder %s2905_s19, %s2899_s13 }
  0xcd   : > { %746 = vmatprep.mubr.bf16.mxu0 %v2761_v13  ;;  %786 = vmatprep.mubr.bf16.mxu1 %v2764_v14  ;;  %v1557_v6 = vmul.f32 %v1525_v63, %v1493_v49  ;;  %v2475_v10 = vunpack.c.h.bf16 %v2536_v52  ;;  %v1549_v13 = vmul.f32 %v1517_v3, %v1485_v55  ;;  %v1534_v14 = vmul.f32 %v1502_v4, %v1502_v4  ;;  %v2541_v63 = vld [vmem:[%s3199_s9 + $0xf8] sm:$0xff]  }
  0xce   : > { %1575 = vadd.xlane.f32.xlu0 %v1541_v15  ;;  %v1487_v15 = vmax.f32 %v2458_v5, 1e-06  ;;  %v2491_v16 = vunpack.c.h.bf16 %v3330_v11  ;;  %v1527_v21 = vmul.f32 %v1495_v9, %v1495_v9  ;;  %v2478_v23 = vunpack.c.l.bf16 %v2537_v12  ;;  %p2908_p4 = por %p2907_p1, %p2906_p3 }
  0xcf   : > { %1577 = vadd.xlane.f32.xlu1 %v1542_v20  ;;  %v1558_v20 = vmul.f32 %v1526_v7, %v1494_v0  ;;  %v1496_v22 = vmax.f32 %v2475_v10, 1e-06  ;;  %v2462_v27 = vunpack.c.l.bf16 %v3335_v19  ;;  %v2479_v32 = vunpack.c.h.bf16 %v2537_v12 }
  0xd0   : > { %v1519_v25 = vmul.f32 %v1487_v15, %v1487_v15  ;;  %v1504_v26 = vmax.f32 %v2491_v16, 1e-06  ;;  %v1497_v31 = vmax.f32 %v2478_v23, 1e-06  ;;  %v2482_v40 = vunpack.c.l.bf16 %v3312_v28  ;;  %p2909_p5 = pnand %p2908_p4, %p2902_p12 }
  0xd1   : > { %v1528_v30 = vmul.f32 %v1496_v22, %v1496_v22  ;;  %v2451_v46 = vunpack.c.h.bf16 %v3307_v8  ;;  %v2486_v52 = vunpack.c.l.bf16 %v3321_v51  ;;  %v2455_v55 = vunpack.c.h.bf16 %v3317_v36 }
  0xd2   : > { %1579 = vadd.xlane.f32.xlu0 %v1543_v24  ;;  %v1566_v24 = vmul.f32 %v1534_v14, %v1502_v4  ;;  %v1551_v33 = vmul.f32 %v1519_v25, %v1487_v15  ;;  %v1499_v45 = vmax.f32 %v2482_v40, 1e-06  ;;  %v2459_v51 = vunpack.c.h.bf16 %v3326_v59 }
  0xd3   : > { %1581 = vadd.xlane.f32.xlu1 %v1544_v29  ;;  %v1559_v29 = vmul.f32 %v1527_v21, %v1495_v9  ;;  %v1484_v50 = vmax.f32 %v2451_v46, 1e-06  ;;  %v1501_v54 = vmax.f32 %v2486_v52, 1e-06  ;;  %v1486_v8 = vmax.f32 %v2455_v55, 1e-06 }
  0xd4   : > { %747 = vmatmul.mubr.bf16.gmra.mxu0 %v2763_v34  ;;  %787 = vmatmul.mubr.bf16.gmra.mxu1 %v2766_v35  ;;  %v1536_v34 = vmul.f32 %v1504_v26, %v1504_v26  ;;  %v1489_v35 = vmax.f32 %v2462_v27, 1e-06  ;;  %v1531_v49 = vmul.f32 %v1499_v45, %v1499_v45  ;;  %v2494_v3 = vunpack.c.l.bf16 %v2541_v63 }
  0xd5   : > { %756 = vmatprep.mubr.bf16.mxu0 %v2767_v37  ;;  %796 = vmatprep.mubr.bf16.mxu1 %v2770_v38  ;;  %v1560_v37 = vmul.f32 %v1528_v30, %v1496_v22  ;;  %v1529_v38 = vmul.f32 %v1497_v31, %v1497_v31 }
  0xd6   : > { %1583 = vadd.xlane.f32.xlu0 %v1545_v39  ;;  %v1498_v39 = vmax.f32 %v2479_v32, 1e-06  ;;  %v1568_v41 = vmul.f32 %v1536_v34, %v1504_v26  ;;  %v1521_v42 = vmul.f32 %v1489_v35, %v1489_v35  ;;  %v1563_v28 = vmul.f32 %v1531_v49, %v1499_v45 }
  0xd7   : > { %1585 = vadd.xlane.f32.xlu1 %v1546_v43  ;;  %v1561_v43 = vmul.f32 %v1529_v38, %v1497_v31  ;;  %v1505_v5 = vmax.f32 %v2494_v3, 1e-06 }
  0xd8   : > { %v1530_v44 = vmul.f32 %v1498_v39, %v1498_v39 }
  0xd9   : > { %v1537_v9 = vmul.f32 %v1505_v5, %v1505_v5 }
  0xda   : > { %1587 = vadd.xlane.f32.xlu0 %v1547_v47  ;;  %v1553_v47 = vmul.f32 %v1521_v42, %v1489_v35  ;;  %v1562_v48 = vmul.f32 %v1530_v44, %v1498_v39 }
  0xdb   : > { %1603 = vadd.xlane.f32.xlu1 %v1555_v53  ;;  %v1516_v53 = vmul.f32 %v1484_v50, %v1484_v50  ;;  %v1569_v12 = vmul.f32 %v1537_v9, %v1505_v5 }
  0xdc   : > { %757 = vmatmul.mubr.bf16.gmra.mxu0 %v2769_v57  ;;  %797 = vmatmul.mubr.bf16.gmra.mxu1 %v2772_v58  ;;  %v1533_v57 = vmul.f32 %v1501_v54, %v1501_v54  ;;  %v2490_v58 = vunpack.c.l.bf16 %v3330_v11  ;;  %v2495_v11 = vunpack.c.h.bf16 %v2541_v63 }
  0xdd   : > { %766 = vmatprep.mubr.bf16.mxu0 %v2773_v60  ;;  %806 = vmatprep.mubr.bf16.mxu1 %v2776_v61  ;;  %v1548_v56 = vmul.f32 %v1516_v53, %v1484_v50  ;;  %v1518_v61 = vmul.f32 %v1486_v8, %v1486_v8 }
  0xde   : > { %1605 = vadd.xlane.f32.xlu0 %v1556_v62  ;;  %v1565_v60 = vmul.f32 %v1533_v57, %v1501_v54  ;;  %v1503_v62 = vmax.f32 %v2490_v58, 1e-06 }
  0xdf   : > { %1621 = vadd.xlane.f32.xlu1 %v1564_v2  ;;  %v1550_v0 = vmul.f32 %v1518_v61, %v1486_v8  ;;  %v1488_v2 = vmax.f32 %v2459_v51, 1e-06 }
  0xe0   : > { %v1535_v1 = vmul.f32 %v1503_v62, %v1503_v62 }
  0xe1   : > { %v1520_v4 = vmul.f32 %v1488_v2, %v1488_v2 }
  0xe2   : > { %1607 = vadd.xlane.f32.xlu0 %v1557_v6  ;;  %v1567_v36 = vmul.f32 %v1535_v1, %v1503_v62  ;;  %v2463_v6 = vunpack.c.h.bf16 %v3335_v19 }
  0xe3   : > { %1591 = vadd.xlane.f32.xlu1 %v1549_v13  ;;  %v1552_v7 = vmul.f32 %v1520_v4, %v1488_v2  ;;  %v1506_v13 = vmax.f32 %v2495_v11, 1e-06 }
  0xe4   : > { %767 = vmatmul.mubr.bf16.gmra.mxu0 %v2775_v17  ;;  %807 = vmatmul.mubr.bf16.gmra.mxu1 %v2778_v18  ;;  %v1490_v10 = vmax.f32 %v2463_v6, 1e-06 }
  0xe5   : > { %v1538_v14 = vmul.f32 %v1506_v13, %v1506_v13 }
  0xe6   : > { %1609 = vadd.xlane.f32.xlu0 %v1558_v20  ;;  %v1522_v59 = vmul.f32 %v1490_v10, %v1490_v10 }
  0xe7   : > { %1625 = vadd.xlane.f32.xlu1 %v1566_v24  ;;  %v1570_v17 = vmul.f32 %v1538_v14, %v1506_v13 }
  0xe8   : > { %v1554_v15 = vmul.f32 %v1522_v59, %v1490_v10 }
  0xea   : > { %1611 = vadd.xlane.f32.xlu0 %v1559_v29 }
  0xeb   : > { %1595 = vadd.xlane.f32.xlu1 %v1551_v33 }
  0xee   : > { %1613 = vadd.xlane.f32.xlu0 %v1560_v37 }
  0xef   : > { %1629 = vadd.xlane.f32.xlu1 %v1568_v41 }
  0xf2   : > { %1615 = vadd.xlane.f32.xlu0 %v1561_v43 }
  0xf3   : > { %1599 = vadd.xlane.f32.xlu1 %v1553_v47 }
  0xf6   : > { %1617 = vadd.xlane.f32.xlu0 %v1562_v48 }
  0xf7   : > { %1633 = vadd.xlane.f32.xlu1 %v1570_v17 }
  0xfa   : > { %1619 = vadd.xlane.f32.xlu0 %v1563_v28 }
  0xfe   : > { %1589 = vadd.xlane.f32.xlu0 %v1548_v56 }
 0x102   : > { %1623 = vadd.xlane.f32.xlu0 %v1565_v60 }
 0x106   : > { %1593 = vadd.xlane.f32.xlu0 %v1550_v0 }
 0x10a   : > { %1627 = vadd.xlane.f32.xlu0 %v1567_v36 }
 0x10c   : > { %v1090_v16 = vpop.xlane.xlu0 %1089 }
 0x10d   : > { %v1153_v18 = vmul.f32 0.0078125, %v1090_v16 }
 0x10e   : > { %1597 = vadd.xlane.f32.xlu0 %v1552_v7  ;;  %v1094_v20 = vpop.xlane.xlu1 %1093 }
 0x10f   : > { %v1155_v21 = vmul.f32 0.0078125, %v1094_v20  ;;  %1186 = vst.msk [vmem:[#allocation4] sm:$0xff] %vm1185_vm0, %v1153_v18 }
 0x111   : > { %1188 = vst.msk [vmem:[#allocation4 + $0x10] sm:$0xff] %vm1185_vm0, %v1155_v21 }
 0x112   : > { %1631 = vadd.xlane.f32.xlu0 %v1569_v12  ;;  %v1092_v19 = vpop.xlane.xlu0 %1091 }
 0x113   : > { %v1154_v22 = vmul.f32 0.0078125, %v1092_v19  ;;  %v1096_v23 = vpop.xlane.xlu1 %1095 }
 0x114   : > { %v1156_v24 = vmul.f32 0.0078125, %v1096_v23 }
 0x115   : > { %1187 = vst.msk [vmem:[#allocation4 + $0x8] sm:$0xff] %vm1185_vm0, %v1154_v22 }
 0x116   : > { %1601 = vadd.xlane.f32.xlu0 %v1554_v15  ;;  %1189 = vst.msk [vmem:[#allocation4 + $0x18] sm:$0xff] %vm1185_vm0, %v1156_v24  ;;  %v1098_v25 = vpop.xlane.xlu0 %1097 }
 0x117   : > { %v1157_v26 = vmul.f32 0.0078125, %v1098_v25  ;;  %v1100_v27 = vpop.xlane.xlu1 %1099 }
 0x118   : > { %v1158_v29 = vmul.f32 0.0078125, %v1100_v27 }
 0x119   : > { %1190 = vst.msk [vmem:[#allocation4 + $0x20] sm:$0xff] %vm1185_vm0, %v1157_v26 }
 0x11a   : > { %1191 = vst.msk [vmem:[#allocation4 + $0x28] sm:$0xff] %vm1185_vm0, %v1158_v29  ;;  %v1102_v30 = vpop.xlane.xlu0 %1101 }
 0x11b   : > { %v1159_v31 = vmul.f32 0.0078125, %v1102_v30  ;;  %v1104_v32 = vpop.xlane.xlu1 %1103 }
 0x11c   : > { %v1160_v33 = vmul.f32 0.0078125, %v1104_v32 }
 0x11d   : > { %1192 = vst.msk [vmem:[#allocation4 + $0x30] sm:$0xff] %vm1185_vm0, %v1159_v31 }
 0x11e   : > { %1193 = vst.msk [vmem:[#allocation4 + $0x38] sm:$0xff] %vm1185_vm0, %v1160_v33  ;;  %v1106_v34 = vpop.xlane.xlu0 %1105 }
 0x11f   : > { %v1161_v35 = vmul.f32 0.0078125, %v1106_v34  ;;  %v1108_v37 = vpop.xlane.xlu1 %1107 }
 0x120   : > { %v1162_v38 = vmul.f32 0.0078125, %v1108_v37 }
 0x121   : > { %1194 = vst.msk [vmem:[#allocation4 + $0x40] sm:$0xff] %vm1185_vm0, %v1161_v35 }
 0x122   : > { %1195 = vst.msk [vmem:[#allocation4 + $0x48] sm:$0xff] %vm1185_vm0, %v1162_v38  ;;  %v1110_v39 = vpop.xlane.xlu0 %1109 }
 0x123   : > { %v1163_v40 = vmul.f32 0.0078125, %v1110_v39  ;;  %v1112_v41 = vpop.xlane.xlu1 %1111 }
 0x124   : > { %v1164_v42 = vmul.f32 0.0078125, %v1112_v41 }
 0x125   : > { %1196 = vst.msk [vmem:[#allocation4 + $0x50] sm:$0xff] %vm1185_vm0, %v1163_v40 }
 0x126   : > { %1197 = vst.msk [vmem:[#allocation4 + $0x58] sm:$0xff] %vm1185_vm0, %v1164_v42 }
 0x127   : > { %v1114_v43 = vpop.xlane.xlu0 %1113 }
 0x128   : > { %v1165_v44 = vmul.f32 0.0078125, %v1114_v43  ;;  %v1116_v45 = vpop.xlane.xlu1 %1115 }
 0x129   : > { %v1166_v46 = vmul.f32 0.0078125, %v1116_v45 }
 0x12a   : > { %1198 = vst.msk [vmem:[#allocation4 + $0x60] sm:$0xff] %vm1185_vm0, %v1165_v44 }
 0x12b   : > { %1199 = vst.msk [vmem:[#allocation4 + $0x68] sm:$0xff] %vm1185_vm0, %v1166_v46 }
 0x12c   : > { %v1118_v47 = vpop.xlane.xlu0 %1117 }
 0x12d   : > { %v1167_v48 = vmul.f32 0.0078125, %v1118_v47  ;;  %v1120_v49 = vpop.xlane.xlu1 %1119 }
 0x12e   : > { %v1168_v50 = vmul.f32 0.0078125, %v1120_v49 }
 0x12f   : > { %1200 = vst.msk [vmem:[#allocation4 + $0x70] sm:$0xff] %vm1185_vm0, %v1167_v48 }
 0x130   : > { %1201 = vst.msk [vmem:[#allocation4 + $0x78] sm:$0xff] %vm1185_vm0, %v1168_v50  ;;  %v1122_v52 = vpop.xlane.xlu0 %1121 }
 0x131   : > { %v1169_v28 = vmul.f32 0.0078125, %v1122_v52  ;;  %v1124_v53 = vpop.xlane.xlu1 %1123 }
 0x132   : > { %v1170_v54 = vmul.f32 0.0078125, %v1124_v53 }
 0x133   : > { %1202 = vst.msk [vmem:[#allocation4 + $0x80] sm:$0xff] %vm1185_vm0, %v1169_v28 }
 0x134   : > { %1203 = vst.msk [vmem:[#allocation4 + $0x88] sm:$0xff] %vm1185_vm0, %v1170_v54 }
 0x135   : > { %v1126_v55 = vpop.xlane.xlu0 %1125 }
 0x136   : > { %v1171_v56 = vmul.f32 0.0078125, %v1126_v55  ;;  %v1128_v57 = vpop.xlane.xlu1 %1127 }
 0x137   : > { %v1172_v8 = vmul.f32 0.0078125, %v1128_v57 }
 0x138   : > { %1204 = vst.msk [vmem:[#allocation4 + $0x90] sm:$0xff] %vm1185_vm0, %v1171_v56 }
 0x139   : > { %1205 = vst.msk [vmem:[#allocation4 + $0x98] sm:$0xff] %vm1185_vm0, %v1172_v8 }
 0x13a   : > { %v1130_v58 = vpop.xlane.xlu0 %1129 }
 0x13b   : > { %v1173_v60 = vmul.f32 0.0078125, %v1130_v58  ;;  %v1132_v61 = vpop.xlane.xlu1 %1131 }
 0x13c   : > { %v1174_v62 = vmul.f32 0.0078125, %v1132_v61 }
 0x13d   : > { %1206 = vst.msk [vmem:[#allocation4 + $0xa0] sm:$0xff] %vm1185_vm0, %v1173_v60 }
 0x13e   : > { %1207 = vst.msk [vmem:[#allocation4 + $0xa8] sm:$0xff] %vm1185_vm0, %v1174_v62 }
 0x13f   : > { %v1134_v51 = vpop.xlane.xlu0 %1133 }
 0x140   : > { %v1175_v63 = vmul.f32 0.0078125, %v1134_v51  ;;  %v1136_v0 = vpop.xlane.xlu1 %1135 }
 0x141   : > { %v1176_v1 = vmul.f32 0.0078125, %v1136_v0 }
 0x142   : > { %1208 = vst.msk [vmem:[#allocation4 + $0xb0] sm:$0xff] %vm1185_vm0, %v1175_v63 }
 0x143   : > { %1209 = vst.msk [vmem:[#allocation4 + $0xb8] sm:$0xff] %vm1185_vm0, %v1176_v1  ;;  %v1138_v2 = vpop.xlane.xlu0 %1137 }
 0x144   : > { %v1177_v3 = vmul.f32 0.0078125, %v1138_v2  ;;  %v1140_v36 = vpop.xlane.xlu1 %1139 }
 0x145   : > { %v1178_v4 = vmul.f32 0.0078125, %v1140_v36 }
 0x146   : > { %1210 = vst.msk [vmem:[#allocation4 + $0xc0] sm:$0xff] %vm1185_vm0, %v1177_v3 }
 0x147   : > { %1211 = vst.msk [vmem:[#allocation4 + $0xc8] sm:$0xff] %vm1185_vm0, %v1178_v4  ;;  %v1142_v5 = vpop.xlane.xlu0 %1141 }
 0x148   : > { %v1179_v6 = vmul.f32 0.0078125, %v1142_v5  ;;  %v1144_v7 = vpop.xlane.xlu1 %1143 }
 0x149   : > { %v1180_v9 = vmul.f32 0.0078125, %v1144_v7 }
 0x14a   : > { %1212 = vst.msk [vmem:[#allocation4 + $0xd0] sm:$0xff] %vm1185_vm0, %v1179_v6 }
 0x14b   : > { %1213 = vst.msk [vmem:[#allocation4 + $0xd8] sm:$0xff] %vm1185_vm0, %v1180_v9  ;;  %v1146_v10 = vpop.xlane.xlu0 %1145 }
 0x14c   : > { %v1181_v11 = vmul.f32 0.0078125, %v1146_v10  ;;  %v1148_v12 = vpop.xlane.xlu1 %1147 }
 0x14d   : > { %v1182_v59 = vmul.f32 0.0078125, %v1148_v12 }
 0x14e   : > { %1214 = vst.msk [vmem:[#allocation4 + $0xe0] sm:$0xff] %vm1185_vm0, %v1181_v11 }
 0x14f   : > { %1215 = vst.msk [vmem:[#allocation4 + $0xe8] sm:$0xff] %vm1185_vm0, %v1182_v59  ;;  %v1150_v13 = vpop.xlane.xlu0 %1149  ;;  %v2518_v59 = vld [vmem:[%s3191_s29 + $0x40] sm:$0xff]  }
 0x150   : > { %v1183_v14 = vmul.f32 0.0078125, %v1150_v13  ;;  %v1152_v15 = vpop.xlane.xlu1 %1151 }
 0x151   : > { %v1184_v16 = vmul.f32 0.0078125, %v1152_v15 }
 0x152   : > { %1216 = vst.msk [vmem:[#allocation4 + $0xf0] sm:$0xff] %vm1185_vm0, %v1183_v14 }
 0x153   : > { %1217 = vst.msk [vmem:[#allocation4 + $0xf8] sm:$0xff] %vm1185_vm0, %v1184_v16  ;;  %v1572_v17 = vpop.xlane.xlu0 %1571  ;;  %v3407_v16 = vld [vmem:[%s3191_s29] sm:$0xff]  }
 0x154   : > { %v1635_v18 = vmul.f32 0.0078125, %v1572_v17  ;;  %v1574_v20 = vpop.xlane.xlu1 %1573 }
 0x155   : > { %v1636_v21 = vmul.f32 0.0078125, %v1574_v20  ;;  %v3412_v20 = vld [vmem:[%s3191_s29 + $0x20] sm:$0xff]  }
 0x156   : > { %1668 = vst.msk [vmem:[#allocation4] sm:$0xff] %vm1667_vm1, %v1635_v18  ;;  %v2402_v18 = vunpack.c.l.bf16 %v2518_v59 }
 0x157   : > { %1669 = vst.msk [vmem:[#allocation4 + $0x8] sm:$0xff] %vm1667_vm1, %v1636_v21  ;;  %v1576_v19 = vpop.xlane.xlu0 %1575 }
 0x158   : > { %v1637_v22 = vmul.f32 0.0078125, %v1576_v19  ;;  %v1578_v23 = vpop.xlane.xlu1 %1577 }
 0x159   : > { %v1638_v24 = vmul.f32 0.0078125, %v1578_v23 }
 0x15a   : > { %1670 = vst.msk [vmem:[#allocation4 + $0x10] sm:$0xff] %vm1667_vm1, %v1637_v22 }
 0x15b   : > { %v1580_v25 = vpop.xlane.xlu0 %1579  ;;  %1671 = vst.msk [vmem:[#allocation4 + $0x18] sm:$0xff] %vm1667_vm1, %v1638_v24  ;;  %v2307_v24 = vunpack.c.h.bf16 %v3407_v16 }
 0x15c   : > { %v1639_v26 = vmul.f32 0.0078125, %v1580_v25  ;;  %v1582_v27 = vpop.xlane.xlu1 %1581 }
 0x15d   : > { %v1812_v29 = vld [vmem:[#allocation4] sm:$0xff]  ;;  %v1640_v30 = vmul.f32 0.0078125, %v1582_v27 }
 0x15e   : > { %1672 = vst.msk [vmem:[#allocation4 + $0x20] sm:$0xff] %vm1667_vm1, %v1639_v26  ;;  %1860 = vxpose.xlu0.b32.start [1/16] (narrow) %v1812_v29, 8  ;;  %v1813_v32 = vld [vmem:[#allocation4 + $0x8] sm:$0xff]  ;;  %v2323_v29 = vunpack.c.h.bf16 %v3412_v20 }
 0x15f   : > { %v1584_v31 = vpop.xlane.xlu0 %1583  ;;  %1673 = vst.msk [vmem:[#allocation4 + $0x28] sm:$0xff] %vm1667_vm1, %v1640_v30 }
 0x160   : > { %v1641_v33 = vmul.f32 0.0078125, %v1584_v31  ;;  %v1586_v34 = vpop.xlane.xlu1 %1585 }
 0x161   : > { %v1642_v35 = vmul.f32 0.0078125, %v1586_v34  ;;  %v1814_v40 = vld [vmem:[#allocation4 + $0x10] sm:$0xff]  ;;  %v2403_v34 = vunpack.c.h.bf16 %v2518_v59 }
 0x162   : > { %1674 = vst.msk [vmem:[#allocation4 + $0x30] sm:$0xff] %vm1667_vm1, %v1641_v33  ;;  %1861 = vxpose.xlu0.b32.cont [2/16] (narrow) %v1813_v32, 8  ;;  %v1815_v43 = vld [vmem:[#allocation4 + $0x18] sm:$0xff]  ;;  %v3420_v33 = vld [vmem:[%s3191_s29 + $0x60] sm:$0xff]  }
 0x163   : > { %v1588_v37 = vpop.xlane.xlu0 %1587  ;;  %1675 = vst.msk [vmem:[#allocation4 + $0x38] sm:$0xff] %vm1667_vm1, %v1642_v35 }
 0x164   : > { %v1643_v38 = vmul.f32 0.0078125, %v1588_v37  ;;  %v1604_v39 = vpop.xlane.xlu1 %1603 }
 0x165   : > { %v1651_v41 = vmul.f32 0.0078125, %v1604_v39  ;;  %v1816_v50 = vld [vmem:[#allocation4 + $0x20] sm:$0xff] }
 0x166   : > { %1676 = vst.msk [vmem:[#allocation4 + $0x40] sm:$0xff] %vm1667_vm1, %v1643_v38  ;;  %1862 = vxpose.xlu0.b32.cont [3/16] (narrow) %v1814_v40, 8  ;;  %v1817_v53 = vld [vmem:[#allocation4 + $0x28] sm:$0xff] }
 0x167   : > { %v1606_v42 = vpop.xlane.xlu0 %1605  ;;  %1684 = vst.msk [vmem:[#allocation4 + $0x80] sm:$0xff] %vm1667_vm1, %v1651_v41 }
 0x168   : > { %v1652_v44 = vmul.f32 0.0078125, %v1606_v42  ;;  %v1622_v45 = vpop.xlane.xlu1 %1621 }
 0x169   : > { %v1660_v46 = vmul.f32 0.0078125, %v1622_v45  ;;  %v1818_v60 = vld [vmem:[#allocation4 + $0x30] sm:$0xff] }
 0x16a   : > { %1685 = vst.msk [vmem:[#allocation4 + $0x88] sm:$0xff] %vm1667_vm1, %v1652_v44  ;;  %1863 = vxpose.xlu0.b32.cont [4/16] (narrow) %v1815_v43, 8  ;;  %v1819_v51 = vld [vmem:[#allocation4 + $0x38] sm:$0xff] }
 0x16b   : > { %v1608_v47 = vpop.xlane.xlu0 %1607  ;;  %1693 = vst.msk [vmem:[#allocation4 + $0xc8] sm:$0xff] %vm1667_vm1, %v1660_v46  ;;  %v2419_v46 = vunpack.c.h.bf16 %v3420_v33 }
 0x16c   : > { %v1653_v48 = vmul.f32 0.0078125, %v1608_v47  ;;  %v1592_v49 = vpop.xlane.xlu1 %1591 }
 0x16d   : > { %v1645_v52 = vmul.f32 0.0078125, %v1592_v49  ;;  %v1820_v4 = vld [vmem:[#allocation4 + $0x40] sm:$0xff] }
 0x16e   : > { %1686 = vst.msk [vmem:[#allocation4 + $0x90] sm:$0xff] %vm1667_vm1, %v1653_v48  ;;  %1864 = vxpose.xlu0.b32.cont [5/16] (narrow) %v1816_v50, 8 }
 0x16f   : > { %v1610_v28 = vpop.xlane.xlu0 %1609  ;;  %1678 = vst.msk [vmem:[#allocation4 + $0x50] sm:$0xff] %vm1667_vm1, %v1645_v52 }
 0x170   : > { %v1654_v54 = vmul.f32 0.0078125, %v1610_v28  ;;  %v1626_v55 = vpop.xlane.xlu1 %1625  ;;  %v3427_v28 = vld [vmem:[%s3191_s29 + $0x48] sm:$0xff]  }
 0x171   : > { %v1662_v56 = vmul.f32 0.0078125, %v1626_v55 }
 0x172   : > { %1687 = vst.msk [vmem:[#allocation4 + $0x98] sm:$0xff] %vm1667_vm1, %v1654_v54  ;;  %1865 = vxpose.xlu0.b32.cont [6/16] (narrow) %v1817_v53, 8 }
 0x173   : > { %v1612_v57 = vpop.xlane.xlu0 %1611  ;;  %1695 = vst.msk [vmem:[#allocation4 + $0xd8] sm:$0xff] %vm1667_vm1, %v1662_v56 }
 0x174   : > { %v1655_v8 = vmul.f32 0.0078125, %v1612_v57  ;;  %v1596_v58 = vpop.xlane.xlu1 %1595 }
 0x175   : > { %v1647_v61 = vmul.f32 0.0078125, %v1596_v58 }
 0x176   : > { %1688 = vst.msk [vmem:[#allocation4 + $0xa0] sm:$0xff] %vm1667_vm1, %v1655_v8  ;;  %1866 = vxpose.xlu0.b32.cont [7/16] (narrow) %v1818_v60, 8  ;;  %v1822_v42 = vld [vmem:[#allocation4 + $0x50] sm:$0xff] }
 0x177   : > { %v1614_v62 = vpop.xlane.xlu0 %1613  ;;  %1680 = vst.msk [vmem:[#allocation4 + $0x60] sm:$0xff] %vm1667_vm1, %v1647_v61  ;;  %v2406_v61 = vunpack.c.l.bf16 %v3427_v28 }
 0x178   : > { %v1656_v63 = vmul.f32 0.0078125, %v1614_v62  ;;  %v1630_v0 = vpop.xlane.xlu1 %1629 }
 0x179   : > { %v1664_v1 = vmul.f32 0.0078125, %v1630_v0  ;;  %v3434_v0 = vld [vmem:[%s3191_s29 + $0x8] sm:$0xff]  }
 0x17a   : > { %1689 = vst.msk [vmem:[#allocation4 + $0xa8] sm:$0xff] %vm1667_vm1, %v1656_v63  ;;  %1867 = vxpose.xlu0.b32.cont [8/16] (narrow) %v1819_v51, 8 }
 0x17b   : > { %v1616_v2 = vpop.xlane.xlu0 %1615  ;;  %1697 = vst.msk [vmem:[#allocation4 + $0xe8] sm:$0xff] %vm1667_vm1, %v1664_v1 }
 0x17c   : > { %v1657_v3 = vmul.f32 0.0078125, %v1616_v2  ;;  %v1600_v36 = vpop.xlane.xlu1 %1599 }
 0x17d   : > { %v1649_v5 = vmul.f32 0.0078125, %v1600_v36 }
 0x17e   : > { %1690 = vst.msk [vmem:[#allocation4 + $0xb0] sm:$0xff] %vm1667_vm1, %v1657_v3  ;;  %1868 = vxpose.xlu0.b32.cont [9/16] (narrow) %v1820_v4, 8 }
 0x17f   : > { %v1618_v6 = vpop.xlane.xlu0 %1617  ;;  %1682 = vst.msk [vmem:[#allocation4 + $0x70] sm:$0xff] %vm1667_vm1, %v1649_v5  ;;  %v1824_v5 = vld [vmem:[#allocation4 + $0x60] sm:$0xff] }
 0x180   : > { %v1658_v7 = vmul.f32 0.0078125, %v1618_v6 }
 0x182   : > { %1691 = vst.msk [vmem:[#allocation4 + $0xb8] sm:$0xff] %vm1667_vm1, %v1658_v7  ;;  %v2311_v7 = vunpack.c.h.bf16 %v3434_v0 }
 0x183   : > { %v1620_v9 = vpop.xlane.xlu0 %1619 }
 0x184   : > { %v1659_v10 = vmul.f32 0.0078125, %v1620_v9 }
 0x186   : > { %1692 = vst.msk [vmem:[#allocation4 + $0xc0] sm:$0xff] %vm1667_vm1, %v1659_v10 }
 0x187   : > { %v1590_v11 = vpop.xlane.xlu0 %1589 }
 0x188   : > { %v1644_v12 = vmul.f32 0.0078125, %v1590_v11 }
 0x18a   : > { %1677 = vst.msk [vmem:[#allocation4 + $0x48] sm:$0xff] %vm1667_vm1, %v1644_v12 }
 0x18b   : > { %v1624_v13 = vpop.xlane.xlu0 %1623 }
 0x18c   : > { %v1661_v14 = vmul.f32 0.0078125, %v1624_v13  ;;  %v3404_v15 = vpop.f32.mrf.mxu0  ;;  %v3409_v17 = vpop.f32.mrf.mxu1  ;;  %v3441_v13 = vld [vmem:[%s3191_s29 + $0x28] sm:$0xff]  }
 0x18e   : > { %1694 = vst.msk [vmem:[#allocation4 + $0xd0] sm:$0xff] %vm1667_vm1, %v1661_v14  ;;  %v740_v21 = vpop.f32.mrf.mxu0  ;;  %v3415_v19 = vpop.f32.mrf.mxu1 }
 0x18f   : > { %v1379_v22 = vmax.f32 %v740_v21, 0.0  ;;  %v1594_v23 = vpop.xlane.xlu0 %1593 }
 0x190   : > { %v1646_v25 = vmul.f32 0.0078125, %v1594_v23  ;;  %v742_v26 = vpop.f32.mrf.mxu0  ;;  %v782_v27 = vpop.f32.mrf.mxu1  ;;  %v2327_v23 = vunpack.c.h.bf16 %v3441_v13 }
 0x191   : > { %v1395_v30 = vadd.f32 %v2402_v18, %v1379_v22  ;;  %v1821_v31 = vld [vmem:[#allocation4 + $0x48] sm:$0xff]  ;;  %v898_v32 = vmax.f32 %v742_v26, 0.0  ;;  %v906_v35 = vmax.f32 %v782_v27, 0.0 }
 0x192   : > { %1679 = vst.msk [vmem:[#allocation4 + $0x58] sm:$0xff] %vm1667_vm1, %v1646_v25  ;;  %1869 = vxpose.xlu0.b32.cont [10/16] (narrow) %v1821_v31, 8  ;;  %v744_v37 = vpop.f32.mrf.mxu0  ;;  %v784_v38 = vpop.f32.mrf.mxu1  ;;  %v1826_v31 = vld [vmem:[#allocation4 + $0x70] sm:$0xff] }
 0x193   : > { %v1700_v39 = vmax.f32 %v1395_v30, 1e-06  ;;  %v914_v40 = vadd.f32 %v2307_v24, %v898_v32  ;;  %v1628_v41 = vpop.xlane.xlu0 %1627  ;;  %v1380_v43 = vmax.f32 %v744_v37, 0.0  ;;  %v922_v45 = vadd.f32 %v2323_v29, %v906_v35  ;;  %v3448_v35 = vld [vmem:[%s3191_s29 + $0x68] sm:$0xff]  }
 0x194   : > { %v1663_v44 = vmul.f32 0.0078125, %v1628_v41  ;;  %v1388_v47 = vmax.f32 %v784_v38, 0.0  ;;  %v3424_v48 = vpop.f32.mrf.mxu0  ;;  %v3430_v55 = vpop.f32.mrf.mxu1 }
 0x195   : > { %v1219_v49 = vmax.f32 %v914_v40, 1e-06  ;;  %v1716_v50 = vmul.f32 %v1700_v39, %v1700_v39  ;;  %v1396_v52 = vadd.f32 %v2403_v34, %v1380_v43  ;;  %v1227_v53 = vmax.f32 %v922_v45, 1e-06 }
 0x196   : > { %1696 = vst.msk [vmem:[#allocation4 + $0xe0] sm:$0xff] %vm1667_vm1, %v1663_v44  ;;  %1870 = vxpose.xlu0.b32.cont [11/16] (narrow) %v1822_v42, 8  ;;  %v750_v54 = vpop.f32.mrf.mxu0  ;;  %v1404_v60 = vadd.f32 %v2419_v46, %v1388_v47  ;;  %v3437_v36 = vpop.f32.mrf.mxu1  ;;  %v2407_v34 = vunpack.c.h.bf16 %v3427_v28  ;;  %v2423_v43 = vunpack.c.h.bf16 %v3448_v35  ;;  %v2520_v28 = vld [vmem:[%s3191_s29 + $0x50] sm:$0xff]  }
 0x197   : > { %v1598_v56 = vpop.xlane.xlu0 %1597  ;;  %v1732_v57 = vmul.f32 %v1716_v50, %v1700_v39  ;;  %v1235_v8 = vmul.f32 %v1219_v49, %v1219_v49  ;;  %v1701_v51 = vmax.f32 %v1396_v52, 1e-06  ;;  %v1243_v1 = vmul.f32 %v1227_v53, %v1227_v53 }
 0x198   : > { %v1648_v58 = vmul.f32 0.0078125, %v1598_v56  ;;  %v1381_v2 = vmax.f32 %v750_v54, 0.0  ;;  %v752_v3 = vpop.f32.mrf.mxu0  ;;  %v1709_v10 = vmax.f32 %v1404_v60, 1e-06  ;;  %v792_v14 = vpop.f32.mrf.mxu1  ;;  %v2410_v54 = vunpack.c.l.bf16 %v2520_v28  ;;  %v3457_v60 = vld [vmem:[%s3191_s29 + $0x10] sm:$0xff]  }
 0x199   : > { %1748 = vadd.xlane.f32.xlu1 %v1732_v57  ;;  %v1823_v62 = vld [vmem:[#allocation4 + $0x58] sm:$0xff]  ;;  %v1251_v63 = vmul.f32 %v1235_v8, %v1219_v49  ;;  %v900_v9 = vmax.f32 %v752_v3, 0.0  ;;  %v1259_v11 = vmul.f32 %v1243_v1, %v1227_v53  ;;  %v1717_v59 = vmul.f32 %v1701_v51, %v1701_v51 }
 0x19a   : > { %1681 = vst.msk [vmem:[#allocation4 + $0x68] sm:$0xff] %vm1667_vm1, %v1648_v58  ;;  %1871 = vxpose.xlu0.b32.cont [12/16] (narrow) %v1823_v62, 8  ;;  %v1397_v12 = vadd.f32 %v2406_v61, %v1381_v2  ;;  %v1725_v27 = vmul.f32 %v1709_v10, %v1709_v10  ;;  %v908_v29 = vmax.f32 %v792_v14, 0.0  ;;  %v754_v30 = vpop.f32.mrf.mxu0  ;;  %v794_v41 = vpop.f32.mrf.mxu1  ;;  %v2315_v1 = vunpack.c.h.bf16 %v3457_v60 }
 0x19b   : > { %v1632_v4 = vpop.xlane.xlu0 %1631  ;;  %v916_v22 = vadd.f32 %v2311_v7, %v900_v9  ;;  %v1733_v26 = vmul.f32 %v1717_v59, %v1701_v51  ;;  %v1382_v40 = vmax.f32 %v754_v30, 0.0  ;;  %v1390_v44 = vmax.f32 %v794_v41, 0.0 }
 0x19c   : > { %v1665_v6 = vmul.f32 0.0078125, %v1632_v4  ;;  %v1702_v25 = vmax.f32 %v1397_v12, 1e-06  ;;  %v1741_v37 = vmul.f32 %v1725_v27, %v1709_v10  ;;  %v924_v38 = vadd.f32 %v2327_v23, %v908_v29  ;;  %v3450_v42 = vpop.f32.mrf.mxu0  ;;  %v3454_v53 = vpop.f32.mrf.mxu1 }
 0x19d   : > { %1268 = vadd.xlane.f32.xlu1 %v1251_v63  ;;  %v1221_v32 = vmax.f32 %v916_v22, 1e-06  ;;  %v1398_v49 = vadd.f32 %v2407_v34, %v1382_v40  ;;  %v1406_v58 = vadd.f32 %v2423_v43, %v1390_v44  ;;  %v2411_v23 = vunpack.c.h.bf16 %v2520_v28  ;;  %v2521_v44 = vld [vmem:[%s3191_s29 + $0x58] sm:$0xff]  }
 0x19e   : > { %1698 = vst.msk [vmem:[#allocation4 + $0xf0] sm:$0xff] %vm1667_vm1, %v1665_v6  ;;  %1872 = vxpose.xlu0.b32.cont [13/16] (narrow) %v1824_v5, 8  ;;  %v1718_v39 = vmul.f32 %v1702_v25, %v1702_v25  ;;  %v1229_v46 = vmax.f32 %v924_v38, 1e-06  ;;  %v760_v52 = vpop.f32.mrf.mxu0  ;;  %v3459_v51 = vpop.f32.mrf.mxu1  ;;  %v3463_v6 = vld [vmem:[%s3191_s29 + $0x30] sm:$0xff]   ;;  %v3477_v28 = vld [vmem:[%s3191_s29 + $0x18] sm:$0xff]  }
 0x19f   : > { %v1602_v18 = vpop.xlane.xlu0 %1601  ;;  %v1237_v50 = vmul.f32 %v1221_v32, %v1221_v32  ;;  %v1383_v56 = vmax.f32 %v760_v52, 0.0  ;;  %v1703_v57 = vmax.f32 %v1398_v49, 1e-06  ;;  %v1711_v2 = vmax.f32 %v1406_v58, 1e-06 }
 0x1a0   : > { %v1650_v21 = vmul.f32 0.0078125, %v1602_v18  ;;  %v1734_v47 = vmul.f32 %v1718_v39, %v1702_v25  ;;  %v1245_v61 = vmul.f32 %v1229_v46, %v1229_v46  ;;  %v762_v62 = vpop.f32.mrf.mxu0  ;;  %v802_v7 = vpop.f32.mrf.mxu1  ;;  %v2331_v10 = vunpack.c.h.bf16 %v3463_v6 }
 0x1a1   : > { %1284 = vadd.xlane.f32.xlu1 %v1259_v11  ;;  %v1825_v24 = vld [vmem:[#allocation4 + $0x68] sm:$0xff]  ;;  %v1253_v8 = vmul.f32 %v1237_v50, %v1221_v32  ;;  %v1399_v63 = vadd.f32 %v2410_v54, %v1383_v56  ;;  %v1719_v4 = vmul.f32 %v1703_v57, %v1703_v57  ;;  %v902_v5 = vmax.f32 %v762_v62, 0.0 }
 0x1a2   : > { %1683 = vst.msk [vmem:[#allocation4 + $0x78] sm:$0xff] %vm1667_vm1, %v1650_v21  ;;  %1873 = vxpose.xlu0.b32.cont [14/16] (narrow) %v1825_v24, 8  ;;  %v1261_v3 = vmul.f32 %v1245_v61, %v1229_v46  ;;  %v1727_v59 = vmul.f32 %v1711_v2, %v1711_v2  ;;  %v910_v14 = vmax.f32 %v802_v7, 0.0  ;;  %v764_v18 = vpop.f32.mrf.mxu0  ;;  %v1634_v21 = vpop.xlane.xlu1 %1633  ;;  %v2414_v46 = vunpack.c.l.bf16 %v2521_v44 }
 0x1a3   : > { %v1704_v9 = vmax.f32 %v1399_v63, 1e-06  ;;  %v1735_v11 = vmul.f32 %v1719_v4, %v1703_v57  ;;  %v918_v12 = vadd.f32 %v2315_v1, %v902_v5  ;;  %v1666_v24 = vmul.f32 0.0078125, %v1634_v21  ;;  %v804_v32 = vpop.f32.mrf.mxu1  ;;  %v3485_v4 = vld [vmem:[%s3191_s29 + $0x38] sm:$0xff]  }
 0x1a4   : > { %v1743_v27 = vmul.f32 %v1727_v59, %v1711_v2  ;;  %v926_v29 = vadd.f32 %v2331_v10, %v910_v14  ;;  %v1384_v30 = vmax.f32 %v764_v18, 0.0  ;;  %v1392_v41 = vmax.f32 %v804_v32, 0.0 }
 0x1a5   : > { %1750 = vadd.xlane.f32.xlu1 %v1733_v26  ;;  %v1720_v22 = vmul.f32 %v1704_v9, %v1704_v9  ;;  %v1223_v25 = vmax.f32 %v918_v12, 1e-06  ;;  %v3467_v26 = vld [vmem:[%s3191_s29 + $0x70] sm:$0xff]   ;;  %1699 = vst.msk [vmem:[#allocation4 + $0xf8] sm:$0xff] %vm1667_vm1, %v1666_v24  ;;  %v897_v58 = vmax.f32 %v3404_v15, 0.0  ;;  %v2319_v61 = vunpack.c.h.bf16 %v3477_v28 }
 0x1a6   : > { %1874 = vxpose.xlu0.b32.cont [15/16] (narrow) %v1826_v31, 8  ;;  %v3469_v31 = vpop.f32.mrf.mxu0  ;;  %v1231_v38 = vmax.f32 %v926_v29, 1e-06  ;;  %v1400_v39 = vadd.f32 %v2411_v23, %v1384_v30  ;;  %v2322_v7 = vunpack.c.l.bf16 %v3412_v20  ;;  %v905_v10 = vmax.f32 %v3409_v17, 0.0 }
 0x1a7   : > { %v1736_v34 = vmul.f32 %v1720_v22, %v1704_v9  ;;  %v1239_v40 = vmul.f32 %v1223_v25, %v1223_v25  ;;  %v2335_v15 = vunpack.c.h.bf16 %v3485_v4  ;;  %v2418_v21 = vunpack.c.l.bf16 %v3420_v33 }
 0x1a8   : > { %v770_v43 = vpop.f32.mrf.mxu0  ;;  %v1705_v49 = vmax.f32 %v1400_v39, 1e-06  ;;  %v1247_v54 = vmul.f32 %v1231_v38, %v1231_v38  ;;  %v1387_v22 = vmax.f32 %v3415_v19, 0.0  ;;  %v921_v24 = vadd.f32 %v2322_v7, %v905_v10 }
 0x1a9   : > { %1766 = vadd.xlane.f32.xlu1 %v1741_v37  ;;  %v1827_v45 = vld [vmem:[#allocation4 + $0x78] sm:$0xff]  ;;  %v2427_v37 = vunpack.c.h.bf16 %v3467_v26  ;;  %v1255_v50 = vmul.f32 %v1239_v40, %v1223_v25  ;;  %v899_v19 = vmax.f32 %v3424_v48, 0.0 }
 0x1aa   : > { %1875 = vxpose.xlu0.b32.end [16/16] (narrow) %v1827_v45, 8  ;;  %v3474_v45 = vpop.f32.mrf.mxu1  ;;  %v772_v56 = vpop.f32.mrf.mxu0  ;;  %v1263_v1 = vmul.f32 %v1247_v54, %v1231_v38  ;;  %v3493_v25 = vld [vmem:[%s3191_s29 + $0x78] sm:$0xff]   ;;  %v2310_v38 = vunpack.c.l.bf16 %v3434_v0  ;;  %v1226_v33 = vmax.f32 %v921_v24, 1e-06  ;;  %v907_v54 = vmax.f32 %v3430_v55, 0.0 }
 0x1ab   : > { %v1408_v52 = vadd.f32 %v2427_v37, %v1392_v41  ;;  %v904_v62 = vmax.f32 %v772_v56, 0.0  ;;  %v1403_v37 = vadd.f32 %v2418_v21, %v1387_v22  ;;  %v2431_v39 = vunpack.c.h.bf16 %v3493_v25 }
 0x1ac   : > { %v3479_v57 = vpop.f32.mrf.mxu1  ;;  %v774_v18 = vpop.f32.mrf.mxu0  ;;  %v1242_v0 = vmul.f32 %v1226_v33, %v1226_v33  ;;  %v909_v21 = vmax.f32 %v3454_v53, 0.0 }
 0x1ad   : > { %1752 = vadd.xlane.f32.xlu1 %v1734_v47  ;;  %v1385_v47 = vmax.f32 %v770_v43, 0.0  ;;  %v1713_v63 = vmax.f32 %v1408_v52, 1e-06  ;;  %v1386_v32 = vmax.f32 %v774_v18, 0.0  ;;  %v915_v52 = vadd.f32 %v2310_v38, %v899_v19 }
 0x1ae   : > { %v812_v5 = vpop.f32.mrf.mxu1  ;;  %v2330_v18 = vunpack.c.l.bf16 %v3463_v6  ;;  %v903_v6 = vmax.f32 %v3469_v31, 0.0  ;;  %v1393_v31 = vmax.f32 %v3479_v57, 0.0  ;;  %v1829_v57 = vld [vmem:[#allocation4 + $0x88] sm:$0xff] }
 0x1af   : > { %v1401_v2 = vadd.f32 %v2414_v46, %v1385_v47  ;;  %v1729_v59 = vmul.f32 %v1713_v63, %v1713_v63  ;;  %v912_v14 = vmax.f32 %v812_v5, 0.0  ;;  %v1258_v5 = vmul.f32 %v1242_v0, %v1226_v33 }
 0x1b0   : > { %v911_v33 = vmax.f32 %v3474_v45, 0.0 }
 0x1b1   : > { %1272 = vadd.xlane.f32.xlu1 %v1253_v8  ;;  %v2306_v8 = vunpack.c.l.bf16 %v3407_v16  ;;  %v920_v16 = vadd.f32 %v2319_v61, %v904_v62  ;;  %v1745_v17 = vmul.f32 %v1729_v59, %v1713_v63  ;;  %v928_v29 = vadd.f32 %v2335_v15, %v912_v14 }
 0x1b2   : > { %v2422_v62 = vunpack.c.l.bf16 %v3448_v35  ;;  %v1220_v63 = vmax.f32 %v915_v52, 1e-06  ;;  %v901_v15 = vmax.f32 %v3450_v42, 0.0  ;;  %v2426_v42 = vunpack.c.l.bf16 %v3467_v26 }
 0x1b3   : > { %v913_v9 = vadd.f32 %v2306_v8, %v897_v58  ;;  %v1225_v20 = vmax.f32 %v920_v16, 1e-06  ;;  %v1233_v43 = vmax.f32 %v928_v29, 1e-06  ;;  %v2314_v16 = vunpack.c.l.bf16 %v3457_v60 }
 0x1b5   : > { %1288 = vadd.xlane.f32.xlu1 %v1261_v3  ;;  %v1721_v3 = vmul.f32 %v1705_v49, %v1705_v49  ;;  %v1218_v23 = vmax.f32 %v913_v9, 1e-06  ;;  %v1241_v41 = vmul.f32 %v1225_v20, %v1225_v20  ;;  %v1249_v48 = vmul.f32 %v1233_v43, %v1233_v43 }
 0x1b6   : > { %v917_v14 = vadd.f32 %v2314_v16, %v901_v15  ;;  %v1836_v15 = vld [vmem:[#allocation4 + $0xc0] sm:$0xff] }
 0x1b7   : > { %v1737_v12 = vmul.f32 %v1721_v3, %v1705_v49  ;;  %v1234_v40 = vmul.f32 %v1218_v23, %v1218_v23  ;;  %v1708_v49 = vmax.f32 %v1403_v37, 1e-06  ;;  %v1257_v58 = vmul.f32 %v1241_v41, %v1225_v20 }
 0x1b8   : > { %v1265_v7 = vmul.f32 %v1249_v48, %v1233_v43  ;;  %v1222_v60 = vmax.f32 %v917_v14, 1e-06  ;;  %v925_v20 = vadd.f32 %v2330_v18, %v909_v21  ;;  %v2430_v41 = vunpack.c.l.bf16 %v3493_v25  ;;  %v1828_v25 = vld [vmem:[#allocation4 + $0x80] sm:$0xff]  ;;  %v1839_v21 = vld [vmem:[#allocation4 + $0xd8] sm:$0xff] }
 0x1b9   : > { %1754 = vadd.xlane.f32.xlu1 %v1735_v11  ;;  %v1706_v11 = vmax.f32 %v1401_v2, 1e-06  ;;  %v1250_v56 = vmul.f32 %v1234_v40, %v1218_v23  ;;  %v1389_v2 = vmax.f32 %v3437_v36, 0.0  ;;  %v1724_v3 = vmul.f32 %v1708_v49, %v1708_v49 }
 0x1ba   : > { %v1230_v53 = vmax.f32 %v925_v20, 1e-06  ;;  %v1238_v37 = vmul.f32 %v1222_v60, %v1222_v60  ;;  %v1841_v20 = vld [vmem:[#allocation4 + $0xe8] sm:$0xff] }
 0x1bb   : > { %v1722_v30 = vmul.f32 %v1706_v11, %v1706_v11  ;;  %v1405_v10 = vadd.f32 %v2422_v62, %v1389_v2  ;;  %v1740_v35 = vmul.f32 %v1724_v3, %v1708_v49  ;;  %v1832_v62 = vld [vmem:[#allocation4 + $0xa0] sm:$0xff]  ;;  %v1833_v2 = vld [vmem:[#allocation4 + $0xa8] sm:$0xff] }
 0x1bc   : > { %v1246_v19 = vmul.f32 %v1230_v53, %v1230_v53 }
 0x1bd   : > { %1770 = vadd.xlane.f32.xlu1 %v1743_v27  ;;  %v2415_v27 = vunpack.c.h.bf16 %v2521_v44  ;;  %v1738_v46 = vmul.f32 %v1722_v30, %v1706_v11  ;;  %v1710_v36 = vmax.f32 %v1405_v10, 1e-06  ;;  %v2318_v30 = vunpack.c.l.bf16 %v3477_v28 }
 0x1be   : > { %v1262_v43 = vmul.f32 %v1246_v19, %v1230_v53 }
 0x1bf   : > { %v1402_v44 = vadd.f32 %v2415_v27, %v1386_v32  ;;  %v1391_v27 = vmax.f32 %v3459_v51, 0.0  ;;  %v1726_v29 = vmul.f32 %v1710_v36, %v1710_v36  ;;  %v919_v38 = vadd.f32 %v2318_v30, %v903_v6  ;;  %v1843_v6 = vld [vmem:[#allocation4 + $0xf8] sm:$0xff] }
 0x1c0   : > { %v1254_v51 = vmul.f32 %v1238_v37, %v1222_v60 }
 0x1c1   : > { %1756 = vadd.xlane.f32.xlu1 %v1736_v34  ;;  %v814_v34 = vpop.f32.mrf.mxu1  ;;  %v1707_v8 = vmax.f32 %v1402_v44, 1e-06  ;;  %v1407_v32 = vadd.f32 %v2426_v42, %v1391_v27  ;;  %v1224_v40 = vmax.f32 %v919_v38, 1e-06 }
 0x1c2   : > { %v1394_v47 = vmax.f32 %v814_v34, 0.0  ;;  %v1742_v34 = vmul.f32 %v1726_v29, %v1710_v36  ;;  %v1838_v36 = vld [vmem:[#allocation4 + $0xd0] sm:$0xff] }
 0x1c3   : > { %v1723_v55 = vmul.f32 %v1707_v8, %v1707_v8  ;;  %v1712_v26 = vmax.f32 %v1407_v32, 1e-06 }
 0x1c4   : > { %v1410_v61 = vadd.f32 %v2431_v39, %v1394_v47  ;;  %v2334_v39 = vunpack.c.l.bf16 %v3485_v4  ;;  %v1409_v47 = vadd.f32 %v2430_v41, %v1393_v31 }
 0x1c5   : > { %1276 = vadd.xlane.f32.xlu1 %v1255_v50  ;;  %v2326_v50 = vunpack.c.l.bf16 %v3441_v13  ;;  %v1739_v11 = vmul.f32 %v1723_v55, %v1707_v8  ;;  %v1830_v8 = vld [vmem:[#allocation4 + $0x90] sm:$0xff] }
 0x1c6   : > { %v1715_v13 = vmax.f32 %v1410_v61, 1e-06  ;;  %v927_v28 = vadd.f32 %v2334_v39, %v911_v33  ;;  %v1714_v4 = vmax.f32 %v1409_v47, 1e-06  ;;  %v1831_v61 = vld [vmem:[#allocation4 + $0x98] sm:$0xff] }
 0x1c8   : > { %v1731_v59 = vmul.f32 %v1715_v13, %v1715_v13  ;;  %v1232_v44 = vmax.f32 %v927_v28, 1e-06 }
 0x1c9   : > { %1292 = vadd.xlane.f32.xlu1 %v1263_v1  ;;  %v923_v1 = vadd.f32 %v2326_v50, %v907_v54  ;;  %v1240_v50 = vmul.f32 %v1224_v40, %v1224_v40 }
 0x1ca   : > { %v1747_v23 = vmul.f32 %v1731_v59, %v1715_v13  ;;  %v1248_v45 = vmul.f32 %v1232_v44, %v1232_v44 }
 0x1cb   : > { %v1228_v9 = vmax.f32 %v923_v1, 1e-06  ;;  %v1256_v52 = vmul.f32 %v1240_v50, %v1224_v40 }
 0x1cc   : > { %v1264_v54 = vmul.f32 %v1248_v45, %v1232_v44 }
 0x1cd   : > { %1758 = vadd.xlane.f32.xlu1 %v1737_v12  ;;  %v1236_v12 = vmul.f32 %v1220_v63, %v1220_v63  ;;  %v1244_v24 = vmul.f32 %v1228_v9, %v1228_v9 }
 0x1cf   : > { %v1252_v22 = vmul.f32 %v1236_v12, %v1220_v63 }
 0x1d1   : > { %1774 = vadd.xlane.f32.xlu1 %v1745_v17  ;;  %v1260_v17 = vmul.f32 %v1244_v24, %v1228_v9  ;;  %v1835_v9 = vld [vmem:[#allocation4 + $0xb8] sm:$0xff]  ;;  %v1840_v24 = vld [vmem:[#allocation4 + $0xe0] sm:$0xff] }
 0x1d5   : > { %1760 = vadd.xlane.f32.xlu1 %v1738_v46  ;;  %v1728_v46 = vmul.f32 %v1712_v26, %v1712_v26 }
 0x1d7   : > { %1266 = vadd.xlane.f32.xlu0 %v1250_v56  ;;  %v1744_v49 = vmul.f32 %v1728_v46, %v1712_v26  ;;  %v1730_v56 = vmul.f32 %v1714_v4, %v1714_v4 }
 0x1d9   : > { %1280 = vadd.xlane.f32.xlu1 %v1257_v58  ;;  %v1746_v0 = vmul.f32 %v1730_v56, %v1714_v4 }
 0x1db   : > { %1282 = vadd.xlane.f32.xlu0 %v1258_v5  ;;  %v1834_v5 = vld [vmem:[#allocation4 + $0xb0] sm:$0xff] }
 0x1dd   : > { %1296 = vadd.xlane.f32.xlu1 %v1265_v7 }
 0x1df   : > { %1764 = vadd.xlane.f32.xlu0 %v1740_v35 }
 0x1e1   : > { %1762 = vadd.xlane.f32.xlu1 %v1739_v11  ;;  %v1837_v11 = vld [vmem:[#allocation4 + $0xc8] sm:$0xff] }
 0x1e3   : > { %1270 = vadd.xlane.f32.xlu0 %v1252_v22 }
 0x1e5   : > { %1778 = vadd.xlane.f32.xlu1 %v1747_v23 }
 0x1e7   : > { %1286 = vadd.xlane.f32.xlu0 %v1260_v17  ;;  %v1842_v17 = vld [vmem:[#allocation4 + $0xf0] sm:$0xff] }
 0x1ea   : > { %v3529_v39 = vpop.trf.xlu0 }
 0x1eb   : > { %1768 = vadd.xlane.f32.xlu0 %v1742_v34 }
 0x1ef   : > { %1274 = vadd.xlane.f32.xlu0 %v1254_v51 }
 0x1f3   : > { %1290 = vadd.xlane.f32.xlu0 %v1262_v43 }
 0x1f7   : > { %1772 = vadd.xlane.f32.xlu0 %v1744_v49 }
 0x1fb   : > { %1278 = vadd.xlane.f32.xlu0 %v1256_v52 }
 0x1ff   : > { %1294 = vadd.xlane.f32.xlu0 %v1264_v54 }
 0x203   : > { %1776 = vadd.xlane.f32.xlu0 %v1746_v0 }
 0x218   : > { %1892 = vxpose.xlu1.b32.start [1/16] (narrow) %v1828_v25, 8 }
 0x21c   : > { %1893 = vxpose.xlu1.b32.cont [2/16] (narrow) %v1829_v57, 8 }
 0x220   : > { %1894 = vxpose.xlu1.b32.cont [3/16] (narrow) %v1830_v8, 8 }
 0x222   : > { %v3514_v58 = vpop.xlane.xlu1 %1748 }
 0x223   : > { %v1780_v19 = vmul.f32 0.0078125, %v3514_v58 }
 0x224   : > { %1895 = vxpose.xlu1.b32.cont [4/16] (narrow) %v1831_v61, 8 }
 0x226   : > { %v1269_v48 = vpop.xlane.xlu1 %1268 }
 0x227   : > { %v1299_v63 = vmul.f32 0.0078125, %v1269_v48 }
 0x228   : > { %1896 = vxpose.xlu1.b32.cont [5/16] (narrow) %v1832_v62, 8 }
 0x229   : > { %1315 = vst.msk [vmem:[#allocation4 + $0x108] sm:$0xff] %vm1185_vm0, %v1299_v63 }
 0x22a   : > { %v1285_v1 = vpop.xlane.xlu1 %1284 }
 0x22b   : > { %v1307_v3 = vmul.f32 0.0078125, %v1285_v1 }
 0x22c   : > { %1897 = vxpose.xlu1.b32.cont [6/16] (narrow) %v1833_v2, 8 }
 0x22d   : > { %1323 = vst.msk [vmem:[#allocation4 + $0x148] sm:$0xff] %vm1185_vm0, %v1307_v3 }
 0x22e   : > { %v1751_v13 = vpop.xlane.xlu1 %1750 }
 0x22f   : > { %v1781_v7 = vmul.f32 0.0078125, %v1751_v13 }
 0x230   : > { %1898 = vxpose.xlu1.b32.cont [7/16] (narrow) %v1834_v5, 8 }
 0x231   : > { %1797 = vst.msk [vmem:[#allocation4 + $0x108] sm:$0xff] %vm1667_vm1, %v1781_v7 }
 0x232   : > { %v1767_v55 = vpop.xlane.xlu1 %1766 }
 0x233   : > { %v1789_v10 = vmul.f32 0.0078125, %v1767_v55 }
 0x234   : > { %1899 = vxpose.xlu1.b32.cont [8/16] (narrow) %v1835_v9, 8 }
 0x235   : > { %1805 = vst.msk [vmem:[#allocation4 + $0x148] sm:$0xff] %vm1667_vm1, %v1789_v10 }
 0x236   : > { %v3520_v16 = vpop.xlane.xlu1 %1752 }
 0x237   : > { %v1782_v54 = vmul.f32 0.0078125, %v3520_v16 }
 0x238   : > { %1900 = vxpose.xlu1.b32.cont [9/16] (narrow) %v1836_v15, 8  ;;  %v1845_v0 = vld [vmem:[#allocation4 + $0x108] sm:$0xff] }
 0x23a   : > { %v1273_v35 = vpop.xlane.xlu1 %1272 }
 0x23b   : > { %v1301_v12 = vmul.f32 0.0078125, %v1273_v35 }
 0x23c   : > { %1901 = vxpose.xlu1.b32.cont [10/16] (narrow) %v1837_v11, 8 }
 0x23d   : > { %1317 = vst.msk [vmem:[#allocation4 + $0x118] sm:$0xff] %vm1185_vm0, %v1301_v12 }
 0x23e   : > { %v1289_v59 = vpop.xlane.xlu1 %1288 }
 0x23f   : > { %v1309_v14 = vmul.f32 0.0078125, %v1289_v59 }
 0x240   : > { %1902 = vxpose.xlu1.b32.cont [11/16] (narrow) %v1838_v36, 8 }
 0x241   : > { %1325 = vst.msk [vmem:[#allocation4 + $0x158] sm:$0xff] %vm1185_vm0, %v1309_v14 }
 0x242   : > { %v1755_v18 = vpop.xlane.xlu1 %1754 }
 0x243   : > { %v1783_v22 = vmul.f32 0.0078125, %v1755_v18 }
 0x244   : > { %1903 = vxpose.xlu1.b32.cont [12/16] (narrow) %v1839_v21, 8  ;;  %v1853_v21 = vld [vmem:[#allocation4 + $0x148] sm:$0xff] }
 0x245   : > { %1799 = vst.msk [vmem:[#allocation4 + $0x118] sm:$0xff] %vm1667_vm1, %v1783_v22 }
 0x246   : > { %v1771_v23 = vpop.xlane.xlu1 %1770 }
 0x247   : > { %v1791_v60 = vmul.f32 0.0078125, %v1771_v23 }
 0x248   : > { %1904 = vxpose.xlu1.b32.cont [13/16] (narrow) %v1840_v24, 8 }
 0x249   : > { %1807 = vst.msk [vmem:[#allocation4 + $0x158] sm:$0xff] %vm1667_vm1, %v1791_v60 }
 0x24a   : > { %v1757_v42 = vpop.xlane.xlu1 %1756 }
 0x24b   : > { %v1784_v1 = vmul.f32 0.0078125, %v1757_v42 }
 0x24c   : > { %1905 = vxpose.xlu1.b32.cont [14/16] (narrow) %v1841_v20, 8  ;;  %v1847_v2 = vld [vmem:[#allocation4 + $0x118] sm:$0xff] }
 0x24e   : > { %v1277_v27 = vpop.xlane.xlu1 %1276 }
 0x24f   : > { %v1303_v29 = vmul.f32 0.0078125, %v1277_v27 }
 0x250   : > { %1906 = vxpose.xlu1.b32.cont [15/16] (narrow) %v1842_v17, 8  ;;  %v1855_v23 = vld [vmem:[#allocation4 + $0x158] sm:$0xff] }
 0x251   : > { %1319 = vst.msk [vmem:[#allocation4 + $0x128] sm:$0xff] %vm1185_vm0, %v1303_v29  ;;  %v1956_v29 = vmax.f32 %v3529_v39, 0.0 }
 0x252   : > { %v1293_v30 = vpop.xlane.xlu1 %1292 }
 0x253   : > { %v1311_v53 = vmul.f32 0.0078125, %v1293_v30  ;;  %vm2576_vm7 = vcmp.lt.f32.partialorder %v1956_v29, 0.0  ;;  %vm2575_vm9 = vcmp.eq.f32.partialorder %v1956_v29, 0.0 }
 0x254   : > { %1907 = vxpose.xlu1.b32.end [16/16] (narrow) %v1843_v6, 8  ;;  %v2577_v6 = vand.u32 2147483647, %v1956_v29 }
 0x255   : > { %1327 = vst.msk [vmem:[#allocation4 + $0x168] sm:$0xff] %vm1185_vm0, %v1311_v53 }
 0x256   : > { %v1759_v32 = vpop.xlane.xlu1 %1758  ;;  %vm2585_vm3 = vweird.f32 %v2577_v6  ;;  %vm2587_vm5 = vcmp.eq.f32.partialorder %v2577_v6, 0.0  ;;  %vm2578_vm11 = vcmp.eq.f32.partialorder %v2577_v6, inf }
 0x257   : > { %v1785_v34 = vmul.f32 0.0078125, %v1759_v32 }
 0x259   : > { %1801 = vst.msk [vmem:[#allocation4 + $0x128] sm:$0xff] %vm1667_vm1, %v1785_v34 }
 0x25a   : > { %v1775_v37 = vpop.xlane.xlu1 %1774 }
 0x25b   : > { %v1793_v38 = vmul.f32 0.0078125, %v1775_v37 }
 0x25d   : > { %1809 = vst.msk [vmem:[#allocation4 + $0x168] sm:$0xff] %vm1667_vm1, %v1793_v38 }
 0x25e   : > { %v1761_v26 = vpop.xlane.xlu1 %1760 }
 0x25f   : > { %v1786_v16 = vmul.f32 0.0078125, %v1761_v26 }
 0x260   : > { %v1267_v33 = vpop.xlane.xlu0 %1266  ;;  %v1849_v15 = vld [vmem:[#allocation4 + $0x128] sm:$0xff] }
 0x261   : > { %v1298_v51 = vmul.f32 0.0078125, %v1267_v33 }
 0x262   : > { %v1281_v40 = vpop.xlane.xlu1 %1280 }
 0x263   : > { %1314 = vst.msk [vmem:[#allocation4 + $0x100] sm:$0xff] %vm1185_vm0, %v1298_v51  ;;  %v1305_v41 = vmul.f32 0.0078125, %v1281_v40 }
 0x264   : > { %1796 = vst.msk [vmem:[#allocation4 + $0x100] sm:$0xff] %vm1667_vm1, %v1780_v19  ;;  %v1283_v28 = vpop.xlane.xlu0 %1282  ;;  %v1857_v60 = vld [vmem:[#allocation4 + $0x168] sm:$0xff]  ;;  %v2581_v19 = vand.u32 2147483648, %v1956_v29 }
 0x265   : > { %v1306_v31 = vmul.f32 0.0078125, %v1283_v28  ;;  %1321 = vst.msk [vmem:[#allocation4 + $0x138] sm:$0xff] %vm1185_vm0, %v1305_v41 }
 0x266   : > { %v1297_v43 = vpop.xlane.xlu1 %1296 }
 0x267   : > { %1322 = vst.msk [vmem:[#allocation4 + $0x140] sm:$0xff] %vm1185_vm0, %v1306_v31  ;;  %v1313_v46 = vmul.f32 0.0078125, %v1297_v43 }
 0x268   : > { %v1765_v44 = vpop.xlane.xlu0 %1764 }
 0x269   : > { %v1788_v47 = vmul.f32 0.0078125, %v1765_v44  ;;  %1329 = vst.msk [vmem:[#allocation4 + $0x178] sm:$0xff] %vm1185_vm0, %v1313_v46  ;;  %v1964_v44 = vlaneseq }
 0x26a   : > { %v1763_v49 = vpop.xlane.xlu1 %1762 }
 0x26b   : > { %1804 = vst.msk [vmem:[#allocation4 + $0x140] sm:$0xff] %vm1667_vm1, %v1788_v47  ;;  %v1844_v50 = vld [vmem:[#allocation4 + $0x100] sm:$0xff]  ;;  %v1787_v4 = vmul.f32 0.0078125, %v1763_v49 }
 0x26c   : > { %v1271_v52 = vpop.xlane.xlu0 %1270  ;;  %1924 = vxpose.xlu0.b32.start [1/16] (narrow) %v1844_v50, 8  ;;  %v1965_v50 = vshrl.u32 %v1964_v44, 7 }
 0x26d   : > { %v1300_v45 = vmul.f32 0.0078125, %v1271_v52  ;;  %1803 = vst.msk [vmem:[#allocation4 + $0x138] sm:$0xff] %vm1667_vm1, %v1787_v4 }
 0x26e   : > { %v1779_v56 = vpop.xlane.xlu1 %1778 }
 0x26f   : > { %1316 = vst.msk [vmem:[#allocation4 + $0x110] sm:$0xff] %vm1185_vm0, %v1300_v45  ;;  %v1795_v25 = vmul.f32 0.0078125, %v1779_v56  ;;  %v1970_v45 = vsub.s32 1, %v1965_v50  ;;  %v1966_v56 = vsub.s32 0, %v1965_v50 }
 0x270   : > { %1798 = vst.msk [vmem:[#allocation4 + $0x110] sm:$0xff] %vm1667_vm1, %v1782_v54  ;;  %v1287_v57 = vpop.xlane.xlu0 %1286  ;;  %1925 = vxpose.xlu0.b32.cont [2/16] (narrow) %v1845_v0, 8 }
 0x271   : > { %v1308_v8 = vmul.f32 0.0078125, %v1287_v57  ;;  %1811 = vst.msk [vmem:[#allocation4 + $0x178] sm:$0xff] %vm1667_vm1, %v1795_v25  ;;  %v1962_v25 = vld [vmem:[#allocation11] ss:$2 sm:$0x7] }
 0x272   : > { %v1852_v18 = vld [vmem:[#allocation4 + $0x140] sm:$0xff] }
 0x273   : > { %1324 = vst.msk [vmem:[#allocation4 + $0x150] sm:$0xff] %vm1185_vm0, %v1308_v8  ;;  %v1971_v8 = vrot.slane %v1962_v25, %v1970_v45 }
 0x274   : > { %v1769_v58 = vpop.xlane.xlu0 %1768  ;;  %v1851_v14 = vld [vmem:[#allocation4 + $0x138] sm:$0xff] }
 0x275   : > { %v1790_v61 = vmul.f32 0.0078125, %v1769_v58 }
 0x277   : > { %1806 = vst.msk [vmem:[#allocation4 + $0x150] sm:$0xff] %vm1667_vm1, %v1790_v61  ;;  %v1846_v48 = vld [vmem:[#allocation4 + $0x110] sm:$0xff]  ;;  %v1967_v61 = vrot.slane %v1962_v25, %v1966_v56 }
 0x278   : > { %v1275_v62 = vpop.xlane.xlu0 %1274  ;;  %1926 = vxpose.xlu0.b32.cont [3/16] (narrow) %v1846_v48, 8  ;;  %v1859_v20 = vld [vmem:[#allocation4 + $0x178] sm:$0xff] }
 0x279   : > { %v1302_v63 = vmul.f32 0.0078125, %v1275_v62  ;;  %v1974_v62 = vsub.s32 2, %v1965_v50 }
 0x27b   : > { %1318 = vst.msk [vmem:[#allocation4 + $0x120] sm:$0xff] %vm1185_vm0, %v1302_v63 }
 0x27c   : > { %1800 = vst.msk [vmem:[#allocation4 + $0x120] sm:$0xff] %vm1667_vm1, %v1784_v1  ;;  %v1291_v3 = vpop.xlane.xlu0 %1290  ;;  %1927 = vxpose.xlu0.b32.cont [4/16] (narrow) %v1847_v2, 8  ;;  %v1983_v1 = vld [vmem:[#allocation11 + $0x1] ss:$2 sm:$0x7] }
 0x27d   : > { %v1310_v13 = vmul.f32 0.0078125, %v1291_v3 }
 0x27e   : > { %v1854_v22 = vld [vmem:[#allocation4 + $0x150] sm:$0xff] }
 0x27f   : > { %1326 = vst.msk [vmem:[#allocation4 + $0x160] sm:$0xff] %vm1185_vm0, %v1310_v13  ;;  %v1992_v13 = vrot.slane %v1983_v1, %v1970_v45 }
 0x280   : > { %v1773_v5 = vpop.xlane.xlu0 %1772 }
 0x281   : > { %v1792_v7 = vmul.f32 0.0078125, %v1773_v5  ;;  %v2985_v5 = vmov 1983009808  }
 0x283   : > { %1808 = vst.msk [vmem:[#allocation4 + $0x160] sm:$0xff] %vm1667_vm1, %v1792_v7  ;;  %v1848_v55 = vld [vmem:[#allocation4 + $0x120] sm:$0xff]  ;;  %v2008_v7 = vunpack.c.l.s4 %v2985_v5 }
 0x284   : > { %1928 = vxpose.xlu0.b32.cont [5/16] (narrow) %v1848_v55, 8  ;;  %v1279_v9 = vpop.xlane.xlu0 %1278 }
 0x285   : > { %v1304_v10 = vmul.f32 0.0078125, %v1279_v9 }
 0x287   : > { %1320 = vst.msk [vmem:[#allocation4 + $0x130] sm:$0xff] %vm1185_vm0, %v1304_v10  ;;  %v1988_v10 = vrot.slane %v1983_v1, %v1966_v56 }
 0x288   : > { %1802 = vst.msk [vmem:[#allocation4 + $0x130] sm:$0xff] %vm1667_vm1, %v1786_v16  ;;  %1929 = vxpose.xlu0.b32.cont [6/16] (narrow) %v1849_v15, 8  ;;  %v1295_v35 = vpop.xlane.xlu0 %1294  ;;  %v1975_v16 = vrot.slane %v1962_v25, %v1974_v62 }
 0x289   : > { %v1312_v11 = vmul.f32 0.0078125, %v1295_v35 }
 0x28a   : > { %v1856_v24 = vld [vmem:[#allocation4 + $0x160] sm:$0xff] }
 0x28b   : > { %1328 = vst.msk [vmem:[#allocation4 + $0x170] sm:$0xff] %vm1185_vm0, %v1312_v11 }
 0x28c   : > { %v1777_v12 = vpop.xlane.xlu0 %1776 }
 0x28d   : > { %v1794_v59 = vmul.f32 0.0078125, %v1777_v12  ;;  %v2009_v12 = vunpack.c.0.s8 %v2008_v7 }
 0x28f   : > { %1810 = vst.msk [vmem:[#allocation4 + $0x170] sm:$0xff] %vm1667_vm1, %v1794_v59  ;;  %v1850_v36 = vld [vmem:[#allocation4 + $0x130] sm:$0xff] }
 0x290   : > { %1930 = vxpose.xlu0.b32.cont [7/16] (narrow) %v1850_v36, 8 }
 0x294   : > { %1931 = vxpose.xlu0.b32.cont [8/16] (narrow) %v1851_v14, 8  ;;  %v1908_v27 = vpop.trf.xlu1  ;;  %v1996_v14 = vrot.slane %v1983_v1, %v1974_v62 }
 0x295   : > { %v1957_v17 = vmax.f32 %v1908_v27, 0.0 }
 0x296   : > { %v1858_v42 = vld [vmem:[#allocation4 + $0x170] sm:$0xff] }
 0x297   : > { %v2595_v30 = vand.u32 2147483647, %v1957_v17  ;;  %v2599_v51 = vand.u32 2147483648, %v1957_v17  ;;  %vm2594_vm6 = vcmp.lt.f32.partialorder %v1957_v17, 0.0  ;;  %vm2593_vm8 = vcmp.eq.f32.partialorder %v1957_v17, 0.0 }
 0x298   : > { %1932 = vxpose.xlu0.b32.cont [9/16] (narrow) %v1852_v18, 8 }
 0x299   : > { %2779 = vlog2.f32 %v2595_v30  ;;  %vm2603_vm2 = vweird.f32 %v2595_v30  ;;  %vm2605_vm4 = vcmp.eq.f32.partialorder %v2595_v30, 0.0  ;;  %vm2596_vm10 = vcmp.eq.f32.partialorder %v2595_v30, inf }
 0x29a   : > { %2781 = vlog2.f32 %v2577_v6 }
 0x29c   : > { %1933 = vxpose.xlu0.b32.cont [10/16] (narrow) %v1853_v21, 8 }
 0x2a0   : > { %1934 = vxpose.xlu0.b32.cont [11/16] (narrow) %v1854_v22, 8 }
 0x2a4   : > { %1935 = vxpose.xlu0.b32.cont [12/16] (narrow) %v1855_v23, 8 }
 0x2a6   : > { %v2780_v53 = vpop.eup %2779 }
 0x2a7   : > { %v2782_v32 = vpop.eup %2781  ;;  %v2600_v34 = vmul.f32 0.33333334, %v2780_v53 }
 0x2a8   : > { %1936 = vxpose.xlu0.b32.cont [13/16] (narrow) %v1856_v24, 8  ;;  %v2582_v37 = vmul.f32 0.33333334, %v2782_v32  ;;  %v2012_v24 = vsub.s32 %v2009_v12, %v1965_v50 }
 0x2a9   : > { %2783 = vpow2.f32 %v2600_v34 }
 0x2aa   : > { %2785 = vpow2.f32 %v2582_v37 }
 0x2ac   : > { %1937 = vxpose.xlu0.b32.cont [14/16] (narrow) %v1857_v60, 8 }
 0x2b0   : > { %1938 = vxpose.xlu0.b32.cont [15/16] (narrow) %v1858_v42, 8 }
 0x2b4   : > { %1939 = vxpose.xlu0.b32.end [16/16] (narrow) %v1859_v20, 8 }
 0x2b6   : > { %v2784_v39 = vpop.eup %2783 }
 0x2b7   : > { %v2786_v40 = vpop.eup %2785  ;;  %v2602_v41 = vor.u32 %v2784_v39, %v2599_v51 }
 0x2b8   : > { %v2584_v28 = vor.u32 %v2786_v40, %v2581_v19 }
 0x2b9   : > { %v2604_v43 = vsel %vm2603_vm2, %v1957_v17, %v2602_v41 }
 0x2ba   : > { %v2586_v47 = vsel %vm2585_vm3, %v1956_v29, %v2584_v28  ;;  %v2607_v49 = vsel %vm2605_vm4, %v2599_v51, %v2604_v43 }
 0x2bb   : > { %v2589_v4 = vsel %vm2587_vm5, %v2581_v19, %v2586_v47  ;;  %v2608_v52 = vsel %vm2594_vm6, nan, %v2607_v49 }
 0x2bc   : > { %v2590_v54 = vsel %vm2576_vm7, nan, %v2589_v4  ;;  %v2609_v0 = vsel %vm2593_vm8, 0.0, %v2608_v52 }
 0x2bd   : > { %v2591_v57 = vsel %vm2575_vm9, 0.0, %v2590_v54  ;;  %v2610_v58 = vsel %vm2596_vm10, inf, %v2609_v0 }
 0x2be   : > { %v2592_v48 = vsel %vm2578_vm11, inf, %v2591_v57  ;;  %v1980_v3 = vmul.f32 %v2610_v58, %v1971_v8 }
 0x2bf   : > { %v1979_v9 = vmul.f32 %v2592_v48, %v1967_v61 }
 0x2c0   : > { %v2001_v11 = vadd.f32 %v1992_v13, %v1980_v3 }
 0x2c1   : > { %v2000_v18 = vadd.f32 %v1988_v10, %v1979_v9 }
 0x2c3   : > { %v2006_v23 = vcombine.low %v2000_v18, %v2001_v11 }
 0x2c5   : > { %v2013_v42 = vrot.slane %v2006_v23, %v2012_v24 }
 0x2f4   : > { %v1940_v38 = vpop.trf.xlu0 }
 0x2f5   : > { %v3555_v26 = vmax.f32 %v1940_v38, 0.0 }
 0x2f7   : > { %v3558_v33 = vand.u32 2147483647, %v3555_v26  ;;  %v2617_v63 = vand.u32 2147483648, %v3555_v26  ;;  %vm2612_vm14 = vcmp.lt.f32.partialorder %v3555_v26, 0.0  ;;  %vm2611_vm15 = vcmp.eq.f32.partialorder %v3555_v26, 0.0 }
 0x2f9   : > { %2787 = vlog2.f32 %v3558_v33  ;;  %vm2621_vm12 = vweird.f32 %v3558_v33  ;;  %vm2623_vm13 = vcmp.eq.f32.partialorder %v3558_v33, 0.0  ;;  %vm2614_vm0 = vcmp.eq.f32.partialorder %v3558_v33, inf }
 0x306   : > { %v2788_v31 = vpop.eup %2787 }
 0x307   : > { %v2618_v46 = vmul.f32 0.33333334, %v2788_v31 }
 0x309   : > { %2789 = vpow2.f32 %v2618_v46 }
 0x316   : > { %v2790_v2 = vpop.eup %2789 }
 0x317   : > { %v2620_v55 = vor.u32 %v2790_v2, %v2617_v63 }
 0x319   : > { %v2622_v15 = vsel %vm2621_vm12, %v3555_v26, %v2620_v55 }
 0x31a   : > { %v2625_v35 = vsel %vm2623_vm13, %v2617_v63, %v2622_v15 }
 0x31b   : > { %v2626_v59 = vsel %vm2612_vm14, nan, %v2625_v35 }
 0x31c   : > { %v2627_v36 = vsel %vm2611_vm15, 0.0, %v2626_v59 }
 0x31d   : > { %v2628_v21 = vsel %vm2614_vm0, inf, %v2627_v36 }
 0x31e   : > { %v1981_v22 = vmul.f32 %v2628_v21, %v1975_v16 }
 0x320   : > { %v2002_v60 = vadd.f32 %v1996_v14, %v1981_v22 }
 0x322   : > { %v2020_v20 = vrot.slane %v2002_v60, %v2012_v24 }
 0x324   : > { %v2021_v27 = vcombine.low %v2013_v42, %v2020_v20 }
 0x326   : > { %2023 = vst [vmem:[%s284_s28] sm:$0x3f] %v2021_v27 }
 0x327   : > { %2912 = shalt.err (!%p2909_p5)
}
 0x328   : > { %s2913_s30 = scalar_lea.hbm %s2037_s25, 96  ;;  %s2917_s29 = scalar_lea.hbm %s3607_s4, 288 }
 0x329   : > { %p2914_p2 = scmp.ne.s32.totalorder %s2037_s25, %s2913_s30  ;;  %p2918_p10 = scmp.lt.s32.totalorder %s2037_s25, %s3607_s4 }
 0x32a   : > { %p2919_p0 = scmp.lt.s32.totalorder %s2917_s29, %s2913_s30 }
 0x32b   : > { %p2915_p13 = pnand %p2914_p2, %p3627_p7 }
 0x32c   : > { %p2920_p6 = por %p2919_p0, %p2918_p10 }
 0x32d   : > { %p2916_p8 = pneg %p2915_p13 }
 0x32f   : > { %p2921_p11 = pnand %p2920_p6, %p2916_p8 }
 0x331   : > { %2924 = shalt.err (!%p2921_p11)
}
 0x332   : > { %2642 = dma.vmem_to_hbm [thread:$0]  (%p3627_p7), %s2040_s10, 96, %s2037_s25, %s2025_s7  }
 0x333 PF: > { %p2667_p9 = scmp.ge.s32.totalorder %s2975_s18, 2  ;;  %s2051_s6 = sand.u32 1, %s2963_s15  }
 0x334   : > { %p3628_p12 = scmp.ne.s32.totalorder %s3614_s22, 0  ;;  %s2052_s9 = scalar_lea.sflag [#allocation7], %s2051_s6 }
 0x336   : > { %p2659_p3 = pnand %p2667_p9, %p3628_p12 }
 0x338   : > { %p2660_p1 = pneg %p2659_p3 }
 0x33a   : > { %2958 = dma.done.wait (%p2660_p1), %s2052_s9, 96  }
 0x33b   : > { %2960 = vsyncadd (%p2660_p1), %s2052_s9, 4294967200  ;;  %p21_p4 = scmp.ge.s32.totalorder %s3083_s11, 5   ;;  %s3629_s15 = smov %s2967_s16 }
 0x33c   : > { %s3630_s16 = smov %s2971_s17  ;;  %s3631_s17 = smov %s3099_s20 }
 0x33d   : > { %s3632_s18 = smov %s3083_s11  ;;  %23 = sbr.rel (!%p21_p4) target bundleno = 11 (0xb), region = 105 }
 0x342   :  { %2057 = vsyncpa [#allocation6], 1 }
 0x343   :  { %2059 = vsyncpa [#allocation6 + $0x1], 1 }
 0x344   :  { %2060 = vsyncpa [#allocation9], 1 }
 0x345   :  { %2062 = vsyncpa [#allocation9 + $0x1], 1 }
 0x346   :  { %2063 = vsyncpa [#allocation12], 1 }
 0x347   :  { %2064 = vsyncpa [#allocation7], 1 }
 0x348   :  { %2066 = vsyncpa [#allocation7 + $0x1], 1 }

</bundles_post_ra>
